<compile_context>
chip_gen: v6e
topology: v6e:2x2x1
jax: 0.10.0
libtpu: 0.0.40
codegen_flags: <defaults>
</compile_context>

<pallas_src>
import functools

import jax
import jax.numpy as jnp
from jax.experimental import pallas as pl
from jax.experimental.pallas import tpu as pltpu


def _layer_norm(x, gamma, beta, eps=1e-5):
    mean = jnp.mean(x, axis=-1, keepdims=True)
    var = jnp.mean(jnp.square(x - mean), axis=-1, keepdims=True)
    return (x - mean) * jax.lax.rsqrt(var + eps) * gamma + beta


def transformer_layer_kernel(x_row_ref, x_full_ref,
                             ln1_g_ref, ln1_b_ref,
                             wq_ref, wk_ref, wv_ref,
                             wproj_ref, bproj_ref,
                             ln2_g_ref, ln2_b_ref,
                             w1_ref, b1_ref, w2_ref, b2_ref,
                             o_ref,
                             k_scratch, v_scratch,
                             *, num_heads, head_dim, scale):
    # TODO(synk): optional attention mask / cross-attention input `y` not
    # implemented; forward() is exercised with y=None, mask=None (self-attn).
    n_tile = pl.program_id(1)

    # ---- K/V for the full sequence: computed once per batch element (first
    #      sequence tile) and kept in VMEM scratch across the remaining tiles.
    @pl.when(n_tile == 0)
    def _compute_kv():
        xf = x_full_ref[...].astype(jnp.float32)                       # (N, C)
        xfn = _layer_norm(xf, ln1_g_ref[...], ln1_b_ref[...])
        xfn_b = xfn.astype(jnp.bfloat16)
        k_scratch[...] = jnp.dot(xfn_b, wk_ref[...],
                                 preferred_element_type=jnp.float32)
        v_scratch[...] = jnp.dot(xfn_b, wv_ref[...],
                                 preferred_element_type=jnp.float32)

    x = x_row_ref[...].astype(jnp.float32)                             # (TN, C)

    # ---- attention branch: norm1 -> MHA (Wproj folded into the head loop) ----
    xn = _layer_norm(x, ln1_g_ref[...], ln1_b_ref[...])
    q = jnp.dot(xn.astype(jnp.bfloat16), wq_ref[...],
                preferred_element_type=jnp.float32)
    q = q * scale                                      # fold attention scale once
    k = k_scratch[...]                                                  # (N, C) f32
    v = v_scratch[...]

    attn = jnp.zeros_like(x)                                            # (TN, C) f32
    for h in range(num_heads):                                          # static unroll
        sl = slice(h * head_dim, (h + 1) * head_dim)
        qh = q[:, sl].astype(jnp.bfloat16)                              # (TN, hd)
        kh = k[:, sl].astype(jnp.bfloat16)                              # (N, hd)
        vh = v[:, sl].astype(jnp.bfloat16)                              # (N, hd)
        # s = qh @ kh^T via dot_general (no materialized transpose).
        s = jax.lax.dot_general(qh, kh, (((1,), (1,)), ((), ())),
                                preferred_element_type=jnp.float32)     # (TN, N)
        s = s - jnp.max(s, axis=-1, keepdims=True)
        p = jnp.exp(s)
        p = p * pl.reciprocal(jnp.sum(p, axis=-1, keepdims=True), approx=True)
        pv = jnp.dot(p.astype(jnp.bfloat16), vh,
                     preferred_element_type=jnp.float32)                # (TN, hd)
        # concat(head_h) @ Wproj == sum_h head_h @ Wproj[h]
        attn = attn + jnp.dot(pv.astype(jnp.bfloat16), wproj_ref[h],
                              preferred_element_type=jnp.float32)       # (TN, C)

    x = x + attn + bproj_ref[...]                                       # residual 1

    # ---- MLP branch: norm2 -> fc1 -> relu -> fc2 ----
    xn2 = _layer_norm(x, ln2_g_ref[...], ln2_b_ref[...])
    h1 = jnp.dot(xn2.astype(jnp.bfloat16), w1_ref[...],
                 preferred_element_type=jnp.float32) + b1_ref[...]
    h1 = jnp.maximum(h1, 0.0)
    h2 = jnp.dot(h1.astype(jnp.bfloat16), w2_ref[...],
                 preferred_element_type=jnp.float32) + b2_ref[...]

    o_ref[...] = (x + h2).astype(o_ref.dtype)                           # residual 2


def _seq_tile(n):
    # Tile the sequence for pipelining when it is large; otherwise one tile.
    for t in (256, 128):
        if n % t == 0 and n > t:
            return t
    return n


def transformer_layer(x, params, num_heads):
    B, N, C = x.shape
    head_dim = C // num_heads
    scale = head_dim ** -0.5
    H = params["w1"].shape[1]
    TN = _seq_tile(N)
    n_tiles = N // TN

    # Matmul weights live in VMEM as bf16 (MXU-ready, half the residency);
    # LN affine params and biases stay f32.  Wproj is pre-reshaped to
    # (heads, head_dim, C) so the kernel indexes its leading axis per head.
    # TODO(synk): for production shapes, pad C / head_dim to multiples of 128
    # for lane-dense stores; the toy config (C=32) underutilizes lanes.
    wq = params["wq"].astype(jnp.bfloat16)
    wk = params["wk"].astype(jnp.bfloat16)
    wv = params["wv"].astype(jnp.bfloat16)
    wproj = params["wproj"].reshape(num_heads, head_dim, C).astype(jnp.bfloat16)
    w1 = params["w1"].astype(jnp.bfloat16)
    w2 = params["w2"].astype(jnp.bfloat16)

    kern = functools.partial(transformer_layer_kernel,
                             num_heads=num_heads, head_dim=head_dim, scale=scale)

    def const_spec(shape):
        zeros = (0,) * len(shape)
        return pl.BlockSpec(shape, lambda b, n, _z=zeros: _z)

    flops = int(B * N * (8 * C * C + 4 * N * C + 4 * C * H))
    transcendentals = int(B * num_heads * N * N + 8 * B * N)
    bytes_accessed = int(2 * B * N * C * x.dtype.itemsize
                         + (4 * C * C + 2 * C * H) * 2 + (8 * C + 2 * H) * 4)

    return pl.pallas_call(
        kern,
        out_shape=jax.ShapeDtypeStruct((B, N, C), x.dtype),
        grid=(B, n_tiles),
        in_specs=[
            pl.BlockSpec((None, TN, C), lambda b, n: (b, n, 0)),   # x (Q/row tile)
            pl.BlockSpec((None, N, C), lambda b, n: (b, 0, 0)),    # x (full seq for K/V)
            const_spec((1, C)), const_spec((1, C)),                # ln1 gamma/beta
            const_spec((C, C)), const_spec((C, C)), const_spec((C, C)),   # Wq, Wk, Wv
            const_spec((num_heads, head_dim, C)), const_spec((1, C)),     # Wproj, bproj
            const_spec((1, C)), const_spec((1, C)),                # ln2 gamma/beta
            const_spec((C, H)), const_spec((1, H)),                # fc1
            const_spec((H, C)), const_spec((1, C)),                # fc2
        ],
        out_specs=pl.BlockSpec((None, TN, C), lambda b, n: (b, n, 0)),
        scratch_shapes=[pltpu.VMEM((N, C), jnp.float32),           # K (full sequence)
                        pltpu.VMEM((N, C), jnp.float32)],          # V (full sequence)
        compiler_params=pltpu.CompilerParams(
            dimension_semantics=("parallel", "arbitrary"),
            vmem_limit_bytes=48 << 20),
        cost_estimate=pl.CostEstimate(flops=flops,
                                      transcendentals=transcendentals,
                                      bytes_accessed=bytes_accessed),
    )(x, x,
      params["ln1_g"], params["ln1_b"],
      wq, wk, wv, wproj, params["bproj"],
      params["ln2_g"], params["ln2_b"],
      w1, params["b1"], w2, params["b2"])


def reference(x, p, num_heads):
    """Plain-JAX (f32) replica of the PyTorch TransformerLayer.forward
    (bias=False on q/kv projections, dropout=0, act=relu)."""
    def ln(v, g, b):
        m = v.mean(-1, keepdims=True)
        var = ((v - m) ** 2).mean(-1, keepdims=True)
        return (v - m) / jnp.sqrt(var + 1e-5) * g + b

    B, N, C = x.shape
    hd = C // num_heads
    xn = ln(x, p["ln1_g"], p["ln1_b"])
    q = (xn @ p["wq"]).reshape(B, N, num_heads, hd)
    k = (xn @ p["wk"]).reshape(B, N, num_heads, hd)
    v = (xn @ p["wv"]).reshape(B, N, num_heads, hd)
    att = jnp.einsum('bnhd,bmhd->bnmh', q, k) * (hd ** -0.5)
    att = jax.nn.softmax(att, axis=2)
    out = jnp.einsum('bnmh,bmhd->bnhd', att, v).reshape(B, N, C)
    out = out @ p["wproj"] + p["bproj"]
    x = x + out
    xn2 = ln(x, p["ln2_g"], p["ln2_b"])
    h = jax.nn.relu(xn2 @ p["w1"] + p["b1"])
    return x + h @ p["w2"] + p["b2"]


if __name__ == "__main__":
    B, N, C, num_heads = 2, 8, 32, 4
    H = int(C * 4.0)

    key = jax.random.PRNGKey(0)
    ks = jax.random.split(key, 12)

    def w(k, shape, s=0.02):
        return (s * jax.random.normal(k, shape)).astype(jnp.float32)

    # PyTorch Linear weights are (out, in); stored pre-transposed (in, out) so
    # the kernel computes y = x @ W (+ b).  to_queries / to_keys_values have
    # bias=False; project / fc1 / fc2 have bias; LayerNorm has affine params.
    params = {
        "ln1_g": (1.0 + w(ks[0], (1, C), 0.1)),
        "ln1_b": w(ks[1], (1, C), 0.1),
        "wq": w(ks[2], (C, C)),
        "wk": w(ks[3], (C, C)),
        "wv": w(ks[4], (C, C)),
        "wproj": w(ks[5], (C, C)),
        "bproj": w(ks[6], (1, C), 0.1),
        "ln2_g": (1.0 + w(ks[7], (1, C), 0.1)),
        "ln2_b": w(ks[8], (1, C), 0.1),
        "w1": w(ks[9], (C, H)),
        "b1": w(ks[10], (1, H), 0.1),
        "w2": w(ks[11], (H, C)),
        "b2": jnp.zeros((1, C), jnp.float32),
    }

    x = jax.random.normal(jax.random.PRNGKey(1), (B, N, C), dtype=jnp.float32)

    out = transformer_layer(x, params, num_heads)
    out = jax.block_until_ready(out)

    ref = reference(x, params, num_heads)
    assert out.shape == (B, N, C)
    # Tolerance widened vs a pure-f32 kernel: bf16 MXU operands + approx
    # reciprocal in softmax (accumulation / residuals remain f32).
    assert jnp.allclose(out, ref, atol=2e-2, rtol=2e-2), float(jnp.abs(out - ref).max())

    print("KERNEL_OK")
</pallas_src>

<mosaic_0001>
module attributes {stable_mosaic.version = 11 : i64} {
  func.func @transformer_layer_kernel(%arg0: i32, %arg1: i32, %arg2: memref<1x8x32xf32, #tpu.memory_space<vmem>>, %arg3: memref<1x8x32xf32, #tpu.memory_space<vmem>>, %arg4: memref<1x32xf32, #tpu.memory_space<vmem>>, %arg5: memref<1x32xf32, #tpu.memory_space<vmem>>, %arg6: memref<32x32xbf16, #tpu.memory_space<vmem>>, %arg7: memref<32x32xbf16, #tpu.memory_space<vmem>>, %arg8: memref<32x32xbf16, #tpu.memory_space<vmem>>, %arg9: memref<4x8x32xbf16, #tpu.memory_space<vmem>>, %arg10: memref<1x32xf32, #tpu.memory_space<vmem>>, %arg11: memref<1x32xf32, #tpu.memory_space<vmem>>, %arg12: memref<1x32xf32, #tpu.memory_space<vmem>>, %arg13: memref<32x128xbf16, #tpu.memory_space<vmem>>, %arg14: memref<1x128xf32, #tpu.memory_space<vmem>>, %arg15: memref<128x32xbf16, #tpu.memory_space<vmem>>, %arg16: memref<1x32xf32, #tpu.memory_space<vmem>>, %arg17: memref<1x8x32xf32, #tpu.memory_space<vmem>>, %arg18: memref<8x32xf32, #tpu.memory_space<vmem>>, %arg19: memref<8x32xf32, #tpu.memory_space<vmem>>) attributes {dimension_semantics = [#tpu.dimension_semantics<parallel>, #tpu.dimension_semantics<arbitrary>], iteration_bounds = array<i64: 2, 1>, scalar_prefetch = 0 : i64, scratch_operands = 2 : i64, tpu.core_type = #tpu.core_type<tc>, window_params = [{transform_indices = @transform_0, window_bounds = array<i64: 1, 8, 32>}, {transform_indices = @transform_1, window_bounds = array<i64: 1, 8, 32>}, {pipeline_mode = #tpu.pipeline_mode<synchronous>, transform_indices = @transform_2, window_bounds = array<i64: 1, 32>}, {pipeline_mode = #tpu.pipeline_mode<synchronous>, transform_indices = @transform_3, window_bounds = array<i64: 1, 32>}, {pipeline_mode = #tpu.pipeline_mode<synchronous>, transform_indices = @transform_4, window_bounds = array<i64: 32, 32>}, {pipeline_mode = #tpu.pipeline_mode<synchronous>, transform_indices = @transform_5, window_bounds = array<i64: 32, 32>}, {pipeline_mode = #tpu.pipeline_mode<synchronous>, transform_indices = @transform_6, window_bounds = array<i64: 32, 32>}, {pipeline_mode = #tpu.pipeline_mode<synchronous>, transform_indices = @transform_7, window_bounds = array<i64: 4, 8, 32>}, {pipeline_mode = #tpu.pipeline_mode<synchronous>, transform_indices = @transform_8, window_bounds = array<i64: 1, 32>}, {pipeline_mode = #tpu.pipeline_mode<synchronous>, transform_indices = @transform_9, window_bounds = array<i64: 1, 32>}, {pipeline_mode = #tpu.pipeline_mode<synchronous>, transform_indices = @transform_10, window_bounds = array<i64: 1, 32>}, {pipeline_mode = #tpu.pipeline_mode<synchronous>, transform_indices = @transform_11, window_bounds = array<i64: 32, 128>}, {pipeline_mode = #tpu.pipeline_mode<synchronous>, transform_indices = @transform_12, window_bounds = array<i64: 1, 128>}, {pipeline_mode = #tpu.pipeline_mode<synchronous>, transform_indices = @transform_13, window_bounds = array<i64: 128, 32>}, {pipeline_mode = #tpu.pipeline_mode<synchronous>, transform_indices = @transform_14, window_bounds = array<i64: 1, 32>}, {transform_indices = @transform_15, window_bounds = array<i64: 1, 8, 32>}]} {
    %c0_i32 = arith.constant 0 : i32
    %0 = arith.cmpi eq, %arg1, %c0_i32 : i32
    %1 = arith.extui %0 : i1 to i32
    %c0_i32_0 = arith.constant 0 : i32
    %2 = arith.cmpi ne, %1, %c0_i32_0 : i32
    scf.if %2 {
      %c0_74 = arith.constant 0 : index
      %c0_75 = arith.constant 0 : index
      %c0_76 = arith.constant 0 : index
      %179 = vector.load %arg3[%c0_74, %c0_75, %c0_76] : memref<1x8x32xf32, #tpu.memory_space<vmem>>, vector<1x8x32xf32>
      %180 = vector.shape_cast %179 : vector<1x8x32xf32> to vector<8x32xf32>
      %c0_77 = arith.constant 0 : index
      %c0_78 = arith.constant 0 : index
      %181 = vector.load %arg4[%c0_77, %c0_78] : memref<1x32xf32, #tpu.memory_space<vmem>>, vector<1x32xf32>
      %c0_79 = arith.constant 0 : index
      %c0_80 = arith.constant 0 : index
      %182 = vector.load %arg5[%c0_79, %c0_80] : memref<1x32xf32, #tpu.memory_space<vmem>>, vector<1x32xf32>
      %cst_81 = arith.constant dense<0.000000e+00> : vector<8xf32>
      %183 = vector.multi_reduction <add>, %180, %cst_81 [1] : vector<8x32xf32> to vector<8xf32>
      %184 = vector.shape_cast %183 : vector<8xf32> to vector<8x1xf32>
      %cst_82 = arith.constant 3.200000e+01 : f32
      %185 = vector.broadcast %cst_82 : f32 to vector<8x1xf32>
      %186 = arith.divf %184, %185 : vector<8x1xf32>
      %187 = vector.broadcast %186 : vector<8x1xf32> to vector<8x32xf32>
      %188 = arith.subf %180, %187 : vector<8x32xf32>
      %189 = arith.mulf %188, %188 : vector<8x32xf32>
      %cst_83 = arith.constant dense<0.000000e+00> : vector<8xf32>
      %190 = vector.multi_reduction <add>, %189, %cst_83 [1] : vector<8x32xf32> to vector<8xf32>
      %191 = vector.shape_cast %190 : vector<8xf32> to vector<8x1xf32>
      %cst_84 = arith.constant 3.200000e+01 : f32
      %192 = vector.broadcast %cst_84 : f32 to vector<8x1xf32>
      %193 = arith.divf %191, %192 : vector<8x1xf32>
      %194 = vector.broadcast %186 : vector<8x1xf32> to vector<8x32xf32>
      %195 = arith.subf %180, %194 : vector<8x32xf32>
      %cst_85 = arith.constant 9.99999974E-6 : f32
      %196 = vector.broadcast %cst_85 : f32 to vector<8x1xf32>
      %197 = arith.addf %193, %196 : vector<8x1xf32>
      %198 = math.rsqrt %197 : vector<8x1xf32>
      %199 = vector.broadcast %198 : vector<8x1xf32> to vector<8x32xf32>
      %200 = arith.mulf %195, %199 : vector<8x32xf32>
      %201 = vector.broadcast %181 : vector<1x32xf32> to vector<8x32xf32>
      %202 = arith.mulf %200, %201 : vector<8x32xf32>
      %203 = vector.broadcast %182 : vector<1x32xf32> to vector<8x32xf32>
      %204 = arith.addf %202, %203 : vector<8x32xf32>
      %205 = arith.truncf %204 : vector<8x32xf32> to vector<8x32xbf16>
      %c0_86 = arith.constant 0 : index
      %c0_87 = arith.constant 0 : index
      %206 = vector.load %arg7[%c0_86, %c0_87] : memref<32x32xbf16, #tpu.memory_space<vmem>>, vector<32x32xbf16>
      %cst_88 = arith.constant dense<0.000000e+00> : vector<8x32xf32>
      %207 = tpu.matmul %205, %206, %cst_88 {dimension_numbers = #tpu.dot_dimension_numbers<[1], [0], [0], [1], [0, 0, 1, 1], [], []>} : vector<8x32xbf16>, vector<32x32xbf16>, vector<8x32xf32> -> vector<8x32xf32>
      %c0_89 = arith.constant 0 : index
      %c0_90 = arith.constant 0 : index
      %208 = vector.load %arg18[%c0_89, %c0_90] : memref<8x32xf32, #tpu.memory_space<vmem>>, vector<8x32xf32>
      tpu.vector_store %arg18[%c0_89, %c0_90], %207 {strides = array<i32>} : memref<8x32xf32, #tpu.memory_space<vmem>>, vector<8x32xf32>,
      %c0_91 = arith.constant 0 : index
      %c0_92 = arith.constant 0 : index
      %209 = vector.load %arg8[%c0_91, %c0_92] : memref<32x32xbf16, #tpu.memory_space<vmem>>, vector<32x32xbf16>
      %cst_93 = arith.constant dense<0.000000e+00> : vector<8x32xf32>
      %210 = tpu.matmul %205, %209, %cst_93 {dimension_numbers = #tpu.dot_dimension_numbers<[1], [0], [0], [1], [0, 0, 1, 1], [], []>} : vector<8x32xbf16>, vector<32x32xbf16>, vector<8x32xf32> -> vector<8x32xf32>
      %c0_94 = arith.constant 0 : index
      %c0_95 = arith.constant 0 : index
      %211 = vector.load %arg19[%c0_94, %c0_95] : memref<8x32xf32, #tpu.memory_space<vmem>>, vector<8x32xf32>
      tpu.vector_store %arg19[%c0_94, %c0_95], %210 {strides = array<i32>} : memref<8x32xf32, #tpu.memory_space<vmem>>, vector<8x32xf32>,
    } else {
    }
    %c0 = arith.constant 0 : index
    %c0_1 = arith.constant 0 : index
    %c0_2 = arith.constant 0 : index
    %3 = vector.load %arg2[%c0, %c0_1, %c0_2] : memref<1x8x32xf32, #tpu.memory_space<vmem>>, vector<1x8x32xf32>
    %4 = vector.shape_cast %3 : vector<1x8x32xf32> to vector<8x32xf32>
    %c0_3 = arith.constant 0 : index
    %c0_4 = arith.constant 0 : index
    %5 = vector.load %arg4[%c0_3, %c0_4] : memref<1x32xf32, #tpu.memory_space<vmem>>, vector<1x32xf32>
    %c0_5 = arith.constant 0 : index
    %c0_6 = arith.constant 0 : index
    %6 = vector.load %arg5[%c0_5, %c0_6] : memref<1x32xf32, #tpu.memory_space<vmem>>, vector<1x32xf32>
    %cst = arith.constant dense<0.000000e+00> : vector<8xf32>
    %7 = vector.multi_reduction <add>, %4, %cst [1] : vector<8x32xf32> to vector<8xf32>
    %8 = vector.shape_cast %7 : vector<8xf32> to vector<8x1xf32>
    %cst_7 = arith.constant 3.200000e+01 : f32
    %9 = vector.broadcast %cst_7 : f32 to vector<8x1xf32>
    %10 = arith.divf %8, %9 : vector<8x1xf32>
    %11 = vector.broadcast %10 : vector<8x1xf32> to vector<8x32xf32>
    %12 = arith.subf %4, %11 : vector<8x32xf32>
    %13 = arith.mulf %12, %12 : vector<8x32xf32>
    %cst_8 = arith.constant dense<0.000000e+00> : vector<8xf32>
    %14 = vector.multi_reduction <add>, %13, %cst_8 [1] : vector<8x32xf32> to vector<8xf32>
    %15 = vector.shape_cast %14 : vector<8xf32> to vector<8x1xf32>
    %cst_9 = arith.constant 3.200000e+01 : f32
    %16 = vector.broadcast %cst_9 : f32 to vector<8x1xf32>
    %17 = arith.divf %15, %16 : vector<8x1xf32>
    %18 = vector.broadcast %10 : vector<8x1xf32> to vector<8x32xf32>
    %19 = arith.subf %4, %18 : vector<8x32xf32>
    %cst_10 = arith.constant 9.99999974E-6 : f32
    %20 = vector.broadcast %cst_10 : f32 to vector<8x1xf32>
    %21 = arith.addf %17, %20 : vector<8x1xf32>
    %22 = math.rsqrt %21 : vector<8x1xf32>
    %23 = vector.broadcast %22 : vector<8x1xf32> to vector<8x32xf32>
    %24 = arith.mulf %19, %23 : vector<8x32xf32>
    %25 = vector.broadcast %5 : vector<1x32xf32> to vector<8x32xf32>
    %26 = arith.mulf %24, %25 : vector<8x32xf32>
    %27 = vector.broadcast %6 : vector<1x32xf32> to vector<8x32xf32>
    %28 = arith.addf %26, %27 : vector<8x32xf32>
    %29 = arith.truncf %28 : vector<8x32xf32> to vector<8x32xbf16>
    %c0_11 = arith.constant 0 : index
    %c0_12 = arith.constant 0 : index
    %30 = vector.load %arg6[%c0_11, %c0_12] : memref<32x32xbf16, #tpu.memory_space<vmem>>, vector<32x32xbf16>
    %cst_13 = arith.constant dense<0.000000e+00> : vector<8x32xf32>
    %31 = tpu.matmul %29, %30, %cst_13 {dimension_numbers = #tpu.dot_dimension_numbers<[1], [0], [0], [1], [0, 0, 1, 1], [], []>} : vector<8x32xbf16>, vector<32x32xbf16>, vector<8x32xf32> -> vector<8x32xf32>
    %cst_14 = arith.constant 0.353553385 : f32
    %32 = vector.broadcast %cst_14 : f32 to vector<8x32xf32>
    %33 = arith.mulf %31, %32 : vector<8x32xf32>
    %c0_15 = arith.constant 0 : index
    %c0_16 = arith.constant 0 : index
    %34 = vector.load %arg18[%c0_15, %c0_16] : memref<8x32xf32, #tpu.memory_space<vmem>>, vector<8x32xf32>
    %c0_17 = arith.constant 0 : index
    %c0_18 = arith.constant 0 : index
    %35 = vector.load %arg19[%c0_17, %c0_18] : memref<8x32xf32, #tpu.memory_space<vmem>>, vector<8x32xf32>
    %cst_19 = arith.constant 0.000000e+00 : f32
    %36 = vector.broadcast %cst_19 : f32 to vector<8x32xf32>
    %37 = vector.extract_strided_slice %33 {offsets = [0, 0], sizes = [8, 8], strides = [1, 1]} : vector<8x32xf32> to vector<8x8xf32>
    %38 = arith.truncf %37 : vector<8x8xf32> to vector<8x8xbf16>
    %39 = vector.extract_strided_slice %34 {offsets = [0, 0], sizes = [8, 8], strides = [1, 1]} : vector<8x32xf32> to vector<8x8xf32>
    %40 = arith.truncf %39 : vector<8x8xf32> to vector<8x8xbf16>
    %41 = vector.extract_strided_slice %35 {offsets = [0, 0], sizes = [8, 8], strides = [1, 1]} : vector<8x32xf32> to vector<8x8xf32>
    %42 = arith.truncf %41 : vector<8x8xf32> to vector<8x8xbf16>
    %cst_20 = arith.constant dense<0.000000e+00> : vector<8x8xf32>
    %43 = tpu.matmul %38, %40, %cst_20 {dimension_numbers = #tpu.dot_dimension_numbers<[1], [1], [0], [0], [0, 0, 1, 0], [], []>} : vector<8x8xbf16>, vector<8x8xbf16>, vector<8x8xf32> -> vector<8x8xf32>
    %cst_21 = arith.constant dense<0xFF800000> : vector<8xf32>
    %44 = vector.multi_reduction <maximumf>, %43, %cst_21 [1] : vector<8x8xf32> to vector<8xf32>
    %45 = vector.shape_cast %44 : vector<8xf32> to vector<8x1xf32>
    %46 = vector.broadcast %45 : vector<8x1xf32> to vector<8x8xf32>
    %47 = arith.subf %43, %46 : vector<8x8xf32>
    %48 = math.exp %47 : vector<8x8xf32>
    %cst_22 = arith.constant dense<0.000000e+00> : vector<8xf32>
    %49 = vector.multi_reduction <add>, %48, %cst_22 [1] : vector<8x8xf32> to vector<8xf32>
    %50 = vector.shape_cast %49 : vector<8xf32> to vector<8x1xf32>
    %51 = tpu.reciprocal %50 {approx = true} : vector<8x1xf32> -> vector<8x1xf32>
    %52 = vector.broadcast %51 : vector<8x1xf32> to vector<8x8xf32>
    %53 = arith.mulf %48, %52 : vector<8x8xf32>
    %54 = arith.truncf %53 : vector<8x8xf32> to vector<8x8xbf16>
    %cst_23 = arith.constant dense<0.000000e+00> : vector<8x8xf32>
    %55 = tpu.matmul %54, %42, %cst_23 {dimension_numbers = #tpu.dot_dimension_numbers<[1], [0], [0], [1], [0, 0, 1, 1], [], []>} : vector<8x8xbf16>, vector<8x8xbf16>, vector<8x8xf32> -> vector<8x8xf32>
    %56 = arith.truncf %55 : vector<8x8xf32> to vector<8x8xbf16>
    %c0_24 = arith.constant 0 : index
    %c0_25 = arith.constant 0 : index
    %c0_26 = arith.constant 0 : index
    %57 = vector.load %arg9[%c0_24, %c0_25, %c0_26] : memref<4x8x32xbf16, #tpu.memory_space<vmem>>, vector<1x8x32xbf16>
    %58 = vector.shape_cast %57 : vector<1x8x32xbf16> to vector<8x32xbf16>
    %cst_27 = arith.constant dense<0.000000e+00> : vector<8x32xf32>
    %59 = tpu.matmul %56, %58, %cst_27 {dimension_numbers = #tpu.dot_dimension_numbers<[1], [0], [0], [1], [0, 0, 1, 1], [], []>} : vector<8x8xbf16>, vector<8x32xbf16>, vector<8x32xf32> -> vector<8x32xf32>
    %60 = arith.addf %36, %59 : vector<8x32xf32>
    %61 = vector.extract_strided_slice %33 {offsets = [0, 8], sizes = [8, 8], strides = [1, 1]} : vector<8x32xf32> to vector<8x8xf32>
    %62 = arith.truncf %61 : vector<8x8xf32> to vector<8x8xbf16>
    %63 = vector.extract_strided_slice %34 {offsets = [0, 8], sizes = [8, 8], strides = [1, 1]} : vector<8x32xf32> to vector<8x8xf32>
    %64 = arith.truncf %63 : vector<8x8xf32> to vector<8x8xbf16>
    %65 = vector.extract_strided_slice %35 {offsets = [0, 8], sizes = [8, 8], strides = [1, 1]} : vector<8x32xf32> to vector<8x8xf32>
    %66 = arith.truncf %65 : vector<8x8xf32> to vector<8x8xbf16>
    %cst_28 = arith.constant dense<0.000000e+00> : vector<8x8xf32>
    %67 = tpu.matmul %62, %64, %cst_28 {dimension_numbers = #tpu.dot_dimension_numbers<[1], [1], [0], [0], [0, 0, 1, 0], [], []>} : vector<8x8xbf16>, vector<8x8xbf16>, vector<8x8xf32> -> vector<8x8xf32>
    %cst_29 = arith.constant dense<0xFF800000> : vector<8xf32>
    %68 = vector.multi_reduction <maximumf>, %67, %cst_29 [1] : vector<8x8xf32> to vector<8xf32>
    %69 = vector.shape_cast %68 : vector<8xf32> to vector<8x1xf32>
    %70 = vector.broadcast %69 : vector<8x1xf32> to vector<8x8xf32>
    %71 = arith.subf %67, %70 : vector<8x8xf32>
    %72 = math.exp %71 : vector<8x8xf32>
    %cst_30 = arith.constant dense<0.000000e+00> : vector<8xf32>
    %73 = vector.multi_reduction <add>, %72, %cst_30 [1] : vector<8x8xf32> to vector<8xf32>
    %74 = vector.shape_cast %73 : vector<8xf32> to vector<8x1xf32>
    %75 = tpu.reciprocal %74 {approx = true} : vector<8x1xf32> -> vector<8x1xf32>
    %76 = vector.broadcast %75 : vector<8x1xf32> to vector<8x8xf32>
    %77 = arith.mulf %72, %76 : vector<8x8xf32>
    %78 = arith.truncf %77 : vector<8x8xf32> to vector<8x8xbf16>
    %cst_31 = arith.constant dense<0.000000e+00> : vector<8x8xf32>
    %79 = tpu.matmul %78, %66, %cst_31 {dimension_numbers = #tpu.dot_dimension_numbers<[1], [0], [0], [1], [0, 0, 1, 1], [], []>} : vector<8x8xbf16>, vector<8x8xbf16>, vector<8x8xf32> -> vector<8x8xf32>
    %80 = arith.truncf %79 : vector<8x8xf32> to vector<8x8xbf16>
    %c1 = arith.constant 1 : index
    %c0_32 = arith.constant 0 : index
    %c0_33 = arith.constant 0 : index
    %81 = vector.load %arg9[%c1, %c0_32, %c0_33] : memref<4x8x32xbf16, #tpu.memory_space<vmem>>, vector<1x8x32xbf16>
    %82 = vector.shape_cast %81 : vector<1x8x32xbf16> to vector<8x32xbf16>
    %cst_34 = arith.constant dense<0.000000e+00> : vector<8x32xf32>
    %83 = tpu.matmul %80, %82, %cst_34 {dimension_numbers = #tpu.dot_dimension_numbers<[1], [0], [0], [1], [0, 0, 1, 1], [], []>} : vector<8x8xbf16>, vector<8x32xbf16>, vector<8x32xf32> -> vector<8x32xf32>
    %84 = arith.addf %60, %83 : vector<8x32xf32>
    %85 = vector.extract_strided_slice %33 {offsets = [0, 16], sizes = [8, 8], strides = [1, 1]} : vector<8x32xf32> to vector<8x8xf32>
    %86 = arith.truncf %85 : vector<8x8xf32> to vector<8x8xbf16>
    %87 = vector.extract_strided_slice %34 {offsets = [0, 16], sizes = [8, 8], strides = [1, 1]} : vector<8x32xf32> to vector<8x8xf32>
    %88 = arith.truncf %87 : vector<8x8xf32> to vector<8x8xbf16>
    %89 = vector.extract_strided_slice %35 {offsets = [0, 16], sizes = [8, 8], strides = [1, 1]} : vector<8x32xf32> to vector<8x8xf32>
    %90 = arith.truncf %89 : vector<8x8xf32> to vector<8x8xbf16>
    %cst_35 = arith.constant dense<0.000000e+00> : vector<8x8xf32>
    %91 = tpu.matmul %86, %88, %cst_35 {dimension_numbers = #tpu.dot_dimension_numbers<[1], [1], [0], [0], [0, 0, 1, 0], [], []>} : vector<8x8xbf16>, vector<8x8xbf16>, vector<8x8xf32> -> vector<8x8xf32>
    %cst_36 = arith.constant dense<0xFF800000> : vector<8xf32>
    %92 = vector.multi_reduction <maximumf>, %91, %cst_36 [1] : vector<8x8xf32> to vector<8xf32>
    %93 = vector.shape_cast %92 : vector<8xf32> to vector<8x1xf32>
    %94 = vector.broadcast %93 : vector<8x1xf32> to vector<8x8xf32>
    %95 = arith.subf %91, %94 : vector<8x8xf32>
    %96 = math.exp %95 : vector<8x8xf32>
    %cst_37 = arith.constant dense<0.000000e+00> : vector<8xf32>
    %97 = vector.multi_reduction <add>, %96, %cst_37 [1] : vector<8x8xf32> to vector<8xf32>
    %98 = vector.shape_cast %97 : vector<8xf32> to vector<8x1xf32>
    %99 = tpu.reciprocal %98 {approx = true} : vector<8x1xf32> -> vector<8x1xf32>
    %100 = vector.broadcast %99 : vector<8x1xf32> to vector<8x8xf32>
    %101 = arith.mulf %96, %100 : vector<8x8xf32>
    %102 = arith.truncf %101 : vector<8x8xf32> to vector<8x8xbf16>
    %cst_38 = arith.constant dense<0.000000e+00> : vector<8x8xf32>
    %103 = tpu.matmul %102, %90, %cst_38 {dimension_numbers = #tpu.dot_dimension_numbers<[1], [0], [0], [1], [0, 0, 1, 1], [], []>} : vector<8x8xbf16>, vector<8x8xbf16>, vector<8x8xf32> -> vector<8x8xf32>
    %104 = arith.truncf %103 : vector<8x8xf32> to vector<8x8xbf16>
    %c2 = arith.constant 2 : index
    %c0_39 = arith.constant 0 : index
    %c0_40 = arith.constant 0 : index
    %105 = vector.load %arg9[%c2, %c0_39, %c0_40] : memref<4x8x32xbf16, #tpu.memory_space<vmem>>, vector<1x8x32xbf16>
    %106 = vector.shape_cast %105 : vector<1x8x32xbf16> to vector<8x32xbf16>
    %cst_41 = arith.constant dense<0.000000e+00> : vector<8x32xf32>
    %107 = tpu.matmul %104, %106, %cst_41 {dimension_numbers = #tpu.dot_dimension_numbers<[1], [0], [0], [1], [0, 0, 1, 1], [], []>} : vector<8x8xbf16>, vector<8x32xbf16>, vector<8x32xf32> -> vector<8x32xf32>
    %108 = arith.addf %84, %107 : vector<8x32xf32>
    %109 = vector.extract_strided_slice %33 {offsets = [0, 24], sizes = [8, 8], strides = [1, 1]} : vector<8x32xf32> to vector<8x8xf32>
    %110 = arith.truncf %109 : vector<8x8xf32> to vector<8x8xbf16>
    %111 = vector.extract_strided_slice %34 {offsets = [0, 24], sizes = [8, 8], strides = [1, 1]} : vector<8x32xf32> to vector<8x8xf32>
    %112 = arith.truncf %111 : vector<8x8xf32> to vector<8x8xbf16>
    %113 = vector.extract_strided_slice %35 {offsets = [0, 24], sizes = [8, 8], strides = [1, 1]} : vector<8x32xf32> to vector<8x8xf32>
    %114 = arith.truncf %113 : vector<8x8xf32> to vector<8x8xbf16>
    %cst_42 = arith.constant dense<0.000000e+00> : vector<8x8xf32>
    %115 = tpu.matmul %110, %112, %cst_42 {dimension_numbers = #tpu.dot_dimension_numbers<[1], [1], [0], [0], [0, 0, 1, 0], [], []>} : vector<8x8xbf16>, vector<8x8xbf16>, vector<8x8xf32> -> vector<8x8xf32>
    %cst_43 = arith.constant dense<0xFF800000> : vector<8xf32>
    %116 = vector.multi_reduction <maximumf>, %115, %cst_43 [1] : vector<8x8xf32> to vector<8xf32>
    %117 = vector.shape_cast %116 : vector<8xf32> to vector<8x1xf32>
    %118 = vector.broadcast %117 : vector<8x1xf32> to vector<8x8xf32>
    %119 = arith.subf %115, %118 : vector<8x8xf32>
    %120 = math.exp %119 : vector<8x8xf32>
    %cst_44 = arith.constant dense<0.000000e+00> : vector<8xf32>
    %121 = vector.multi_reduction <add>, %120, %cst_44 [1] : vector<8x8xf32> to vector<8xf32>
    %122 = vector.shape_cast %121 : vector<8xf32> to vector<8x1xf32>
    %123 = tpu.reciprocal %122 {approx = true} : vector<8x1xf32> -> vector<8x1xf32>
    %124 = vector.broadcast %123 : vector<8x1xf32> to vector<8x8xf32>
    %125 = arith.mulf %120, %124 : vector<8x8xf32>
    %126 = arith.truncf %125 : vector<8x8xf32> to vector<8x8xbf16>
    %cst_45 = arith.constant dense<0.000000e+00> : vector<8x8xf32>
    %127 = tpu.matmul %126, %114, %cst_45 {dimension_numbers = #tpu.dot_dimension_numbers<[1], [0], [0], [1], [0, 0, 1, 1], [], []>} : vector<8x8xbf16>, vector<8x8xbf16>, vector<8x8xf32> -> vector<8x8xf32>
    %128 = arith.truncf %127 : vector<8x8xf32> to vector<8x8xbf16>
    %c3 = arith.constant 3 : index
    %c0_46 = arith.constant 0 : index
    %c0_47 = arith.constant 0 : index
    %129 = vector.load %arg9[%c3, %c0_46, %c0_47] : memref<4x8x32xbf16, #tpu.memory_space<vmem>>, vector<1x8x32xbf16>
    %130 = vector.shape_cast %129 : vector<1x8x32xbf16> to vector<8x32xbf16>
    %cst_48 = arith.constant dense<0.000000e+00> : vector<8x32xf32>
    %131 = tpu.matmul %128, %130, %cst_48 {dimension_numbers = #tpu.dot_dimension_numbers<[1], [0], [0], [1], [0, 0, 1, 1], [], []>} : vector<8x8xbf16>, vector<8x32xbf16>, vector<8x32xf32> -> vector<8x32xf32>
    %132 = arith.addf %108, %131 : vector<8x32xf32>
    %133 = arith.addf %4, %132 : vector<8x32xf32>
    %c0_49 = arith.constant 0 : index
    %c0_50 = arith.constant 0 : index
    %134 = vector.load %arg10[%c0_49, %c0_50] : memref<1x32xf32, #tpu.memory_space<vmem>>, vector<1x32xf32>
    %135 = vector.broadcast %134 : vector<1x32xf32> to vector<8x32xf32>
    %136 = arith.addf %133, %135 : vector<8x32xf32>
    %c0_51 = arith.constant 0 : index
    %c0_52 = arith.constant 0 : index
    %137 = vector.load %arg11[%c0_51, %c0_52] : memref<1x32xf32, #tpu.memory_space<vmem>>, vector<1x32xf32>
    %c0_53 = arith.constant 0 : index
    %c0_54 = arith.constant 0 : index
    %138 = vector.load %arg12[%c0_53, %c0_54] : memref<1x32xf32, #tpu.memory_space<vmem>>, vector<1x32xf32>
    %cst_55 = arith.constant dense<0.000000e+00> : vector<8xf32>
    %139 = vector.multi_reduction <add>, %136, %cst_55 [1] : vector<8x32xf32> to vector<8xf32>
    %140 = vector.shape_cast %139 : vector<8xf32> to vector<8x1xf32>
    %cst_56 = arith.constant 3.200000e+01 : f32
    %141 = vector.broadcast %cst_56 : f32 to vector<8x1xf32>
    %142 = arith.divf %140, %141 : vector<8x1xf32>
    %143 = vector.broadcast %142 : vector<8x1xf32> to vector<8x32xf32>
    %144 = arith.subf %136, %143 : vector<8x32xf32>
    %145 = arith.mulf %144, %144 : vector<8x32xf32>
    %cst_57 = arith.constant dense<0.000000e+00> : vector<8xf32>
    %146 = vector.multi_reduction <add>, %145, %cst_57 [1] : vector<8x32xf32> to vector<8xf32>
    %147 = vector.shape_cast %146 : vector<8xf32> to vector<8x1xf32>
    %cst_58 = arith.constant 3.200000e+01 : f32
    %148 = vector.broadcast %cst_58 : f32 to vector<8x1xf32>
    %149 = arith.divf %147, %148 : vector<8x1xf32>
    %150 = vector.broadcast %142 : vector<8x1xf32> to vector<8x32xf32>
    %151 = arith.subf %136, %150 : vector<8x32xf32>
    %cst_59 = arith.constant 9.99999974E-6 : f32
    %152 = vector.broadcast %cst_59 : f32 to vector<8x1xf32>
    %153 = arith.addf %149, %152 : vector<8x1xf32>
    %154 = math.rsqrt %153 : vector<8x1xf32>
    %155 = vector.broadcast %154 : vector<8x1xf32> to vector<8x32xf32>
    %156 = arith.mulf %151, %155 : vector<8x32xf32>
    %157 = vector.broadcast %137 : vector<1x32xf32> to vector<8x32xf32>
    %158 = arith.mulf %156, %157 : vector<8x32xf32>
    %159 = vector.broadcast %138 : vector<1x32xf32> to vector<8x32xf32>
    %160 = arith.addf %158, %159 : vector<8x32xf32>
    %161 = arith.truncf %160 : vector<8x32xf32> to vector<8x32xbf16>
    %c0_60 = arith.constant 0 : index
    %c0_61 = arith.constant 0 : index
    %162 = vector.load %arg13[%c0_60, %c0_61] : memref<32x128xbf16, #tpu.memory_space<vmem>>, vector<32x128xbf16>
    %cst_62 = arith.constant dense<0.000000e+00> : vector<8x128xf32>
    %163 = tpu.matmul %161, %162, %cst_62 {dimension_numbers = #tpu.dot_dimension_numbers<[1], [0], [0], [1], [0, 0, 1, 1], [], []>} : vector<8x32xbf16>, vector<32x128xbf16>, vector<8x128xf32> -> vector<8x128xf32>
    %c0_63 = arith.constant 0 : index
    %c0_64 = arith.constant 0 : index
    %164 = vector.load %arg14[%c0_63, %c0_64] : memref<1x128xf32, #tpu.memory_space<vmem>>, vector<1x128xf32>
    %165 = vector.broadcast %164 : vector<1x128xf32> to vector<8x128xf32>
    %166 = arith.addf %163, %165 : vector<8x128xf32>
    %cst_65 = arith.constant 0.000000e+00 : f32
    %167 = vector.broadcast %cst_65 : f32 to vector<8x128xf32>
    %168 = arith.maximumf %166, %167 : vector<8x128xf32>
    %169 = arith.truncf %168 : vector<8x128xf32> to vector<8x128xbf16>
    %c0_66 = arith.constant 0 : index
    %c0_67 = arith.constant 0 : index
    %170 = vector.load %arg15[%c0_66, %c0_67] : memref<128x32xbf16, #tpu.memory_space<vmem>>, vector<128x32xbf16>
    %cst_68 = arith.constant dense<0.000000e+00> : vector<8x32xf32>
    %171 = tpu.matmul %169, %170, %cst_68 {dimension_numbers = #tpu.dot_dimension_numbers<[1], [0], [0], [1], [0, 0, 1, 1], [], []>} : vector<8x128xbf16>, vector<128x32xbf16>, vector<8x32xf32> -> vector<8x32xf32>
    %c0_69 = arith.constant 0 : index
    %c0_70 = arith.constant 0 : index
    %172 = vector.load %arg16[%c0_69, %c0_70] : memref<1x32xf32, #tpu.memory_space<vmem>>, vector<1x32xf32>
    %173 = vector.broadcast %172 : vector<1x32xf32> to vector<8x32xf32>
    %174 = arith.addf %171, %173 : vector<8x32xf32>
    %175 = arith.addf %136, %174 : vector<8x32xf32>
    %c0_71 = arith.constant 0 : index
    %c0_72 = arith.constant 0 : index
    %c0_73 = arith.constant 0 : index
    %176 = vector.load %arg17[%c0_71, %c0_72, %c0_73] : memref<1x8x32xf32, #tpu.memory_space<vmem>>, vector<1x8x32xf32>
    %177 = vector.shape_cast %176 : vector<1x8x32xf32> to vector<8x32xf32>
    %178 = vector.shape_cast %175 : vector<8x32xf32> to vector<1x8x32xf32>
    tpu.vector_store %arg17[%c0_71, %c0_72, %c0_73], %178 {strides = array<i32>} : memref<1x8x32xf32, #tpu.memory_space<vmem>>, vector<1x8x32xf32>,
    return
  }
  func.func @transform_0(%arg0: i32, %arg1: i32) -> (i32, i32, i32) {
    %c0_i32 = arith.constant 0 : i32
    %c0_i32_0 = arith.constant 0 : i32
    return %arg0, %arg1, %c0_i32 : i32, i32, i32
  }
  func.func @transform_1(%arg0: i32, %arg1: i32) -> (i32, i32, i32) {
    %c0_i32 = arith.constant 0 : i32
    %c0_i32_0 = arith.constant 0 : i32
    %c0_i32_1 = arith.constant 0 : i32
    return %arg0, %c0_i32, %c0_i32_0 : i32, i32, i32
  }
  func.func @transform_2(%arg0: i32, %arg1: i32) -> (i32, i32) {
    %c0_i32 = arith.constant 0 : i32
    %c0_i32_0 = arith.constant 0 : i32
    %c0_i32_1 = arith.constant 0 : i32
    return %c0_i32, %c0_i32_0 : i32, i32
  }
  func.func @transform_3(%arg0: i32, %arg1: i32) -> (i32, i32) {
    %c0_i32 = arith.constant 0 : i32
    %c0_i32_0 = arith.constant 0 : i32
    %c0_i32_1 = arith.constant 0 : i32
    return %c0_i32, %c0_i32_0 : i32, i32
  }
  func.func @transform_4(%arg0: i32, %arg1: i32) -> (i32, i32) {
    %c0_i32 = arith.constant 0 : i32
    %c0_i32_0 = arith.constant 0 : i32
    %c0_i32_1 = arith.constant 0 : i32
    return %c0_i32, %c0_i32_0 : i32, i32
  }
  func.func @transform_5(%arg0: i32, %arg1: i32) -> (i32, i32) {
    %c0_i32 = arith.constant 0 : i32
    %c0_i32_0 = arith.constant 0 : i32
    %c0_i32_1 = arith.constant 0 : i32
    return %c0_i32, %c0_i32_0 : i32, i32
  }
  func.func @transform_6(%arg0: i32, %arg1: i32) -> (i32, i32) {
    %c0_i32 = arith.constant 0 : i32
    %c0_i32_0 = arith.constant 0 : i32
    %c0_i32_1 = arith.constant 0 : i32
    return %c0_i32, %c0_i32_0 : i32, i32
  }
  func.func @transform_7(%arg0: i32, %arg1: i32) -> (i32, i32, i32) {
    %c0_i32 = arith.constant 0 : i32
    %c0_i32_0 = arith.constant 0 : i32
    %c0_i32_1 = arith.constant 0 : i32
    %c0_i32_2 = arith.constant 0 : i32
    return %c0_i32, %c0_i32_0, %c0_i32_1 : i32, i32, i32
  }
  func.func @transform_8(%arg0: i32, %arg1: i32) -> (i32, i32) {
    %c0_i32 = arith.constant 0 : i32
    %c0_i32_0 = arith.constant 0 : i32
    %c0_i32_1 = arith.constant 0 : i32
    return %c0_i32, %c0_i32_0 : i32, i32
  }
  func.func @transform_9(%arg0: i32, %arg1: i32) -> (i32, i32) {
    %c0_i32 = arith.constant 0 : i32
    %c0_i32_0 = arith.constant 0 : i32
    %c0_i32_1 = arith.constant 0 : i32
    return %c0_i32, %c0_i32_0 : i32, i32
  }
  func.func @transform_10(%arg0: i32, %arg1: i32) -> (i32, i32) {
    %c0_i32 = arith.constant 0 : i32
    %c0_i32_0 = arith.constant 0 : i32
    %c0_i32_1 = arith.constant 0 : i32
    return %c0_i32, %c0_i32_0 : i32, i32
  }
  func.func @transform_11(%arg0: i32, %arg1: i32) -> (i32, i32) {
    %c0_i32 = arith.constant 0 : i32
    %c0_i32_0 = arith.constant 0 : i32
    %c0_i32_1 = arith.constant 0 : i32
    return %c0_i32, %c0_i32_0 : i32, i32
  }
  func.func @transform_12(%arg0: i32, %arg1: i32) -> (i32, i32) {
    %c0_i32 = arith.constant 0 : i32
    %c0_i32_0 = arith.constant 0 : i32
    %c0_i32_1 = arith.constant 0 : i32
    return %c0_i32, %c0_i32_0 : i32, i32
  }
  func.func @transform_13(%arg0: i32, %arg1: i32) -> (i32, i32) {
    %c0_i32 = arith.constant 0 : i32
    %c0_i32_0 = arith.constant 0 : i32
    %c0_i32_1 = arith.constant 0 : i32
    return %c0_i32, %c0_i32_0 : i32, i32
  }
  func.func @transform_14(%arg0: i32, %arg1: i32) -> (i32, i32) {
    %c0_i32 = arith.constant 0 : i32
    %c0_i32_0 = arith.constant 0 : i32
    %c0_i32_1 = arith.constant 0 : i32
    return %c0_i32, %c0_i32_0 : i32, i32
  }
  func.func @transform_15(%arg0: i32, %arg1: i32) -> (i32, i32, i32) {
    %c0_i32 = arith.constant 0 : i32
    %c0_i32_0 = arith.constant 0 : i32
    return %arg0, %arg1, %c0_i32 : i32, i32, i32
  }
}

</mosaic_0001>

<bundles_post_ra>
// kernel: tpu_custom_call.1
= control target key start
LH: loop header
LB: loop body
LE: loop exit
PB: predicated region body
PF: predicated region fallthrough
CT: control target
= control target key end

     0   :  { %s2942_s0 = inlined_call_operand.vmem [shape: f32[2,8,32], index: 0, kind: input, shape index: {}]   ;;  %s2943_s1 = inlined_call_operand.vmem [shape: f32[2,8,32], index: 1, kind: input, shape index: {}]   ;;  %s2944_s2 = inlined_call_operand.hbm [shape: f32[1,32], index: 2, kind: input, shape index: {}]   ;;  %s2945_s3 = inlined_call_operand.hbm [shape: f32[1,32], index: 3, kind: input, shape index: {}]   ;;  %s2946_s4 = inlined_call_operand.vmem [shape: bf16[32,32], index: 4, kind: input, shape index: {}]   ;;  %s2947_s5 = inlined_call_operand.vmem [shape: bf16[32,32], index: 5, kind: input, shape index: {}]   ;;  %s2948_s6 = inlined_call_operand.vmem [shape: bf16[32,32], index: 6, kind: input, shape index: {}]   ;;  %s2949_s7 = inlined_call_operand.hbm [shape: bf16[4,8,32], index: 7, kind: input, shape index: {}]   ;;  %s2950_s8 = inlined_call_operand.hbm [shape: f32[1,32], index: 8, kind: input, shape index: {}]   ;;  %s2951_s9 = inlined_call_operand.hbm [shape: f32[1,32], index: 9, kind: input, shape index: {}]   ;;  %s2952_s10 = inlined_call_operand.vmem [shape: f32[1,32], index: 10, kind: input, shape index: {}]   ;;  %s2953_s11 = inlined_call_operand.vmem [shape: bf16[32,128], index: 11, kind: input, shape index: {}]   ;;  %s2954_s12 = inlined_call_operand.vmem [shape: f32[1,128], index: 12, kind: input, shape index: {}]   ;;  %s2955_s13 = inlined_call_operand.vmem [shape: bf16[128,32], index: 13, kind: input, shape index: {}]   ;;  %s2956_s14 = inlined_call_operand.vmem [shape: f32[1,32], index: 14, kind: input, shape index: {}]   ;;  %s2957_s15 = inlined_call_operand.hbm [shape: f32[2,8,32], index: 15, kind: output, shape index: {}]  }
   0x1   :  { %2970 = sst [smem:[#allocation25_spill]] %s2944_s2 }
   0x2   :  { %2971 = sst [smem:[#allocation26_spill]] %s2945_s3 }
   0x3   :  { %2972 = sst [smem:[#allocation27_spill]] %s2957_s15 }
   0x4   :  { %20 = vsyncpa [#allocation5], 0 }
   0x5   :  { %21 = vsyncpa [#allocation8], 0 }
   0x6   :  { %22 = vsyncpa [#allocation11], 0 }
   0x7   :  { %23 = vsyncpa [#allocation6], 0 }
   0x8   :  { %25 = vsyncpa [#allocation6 + $0x1], 0  ;;  %s2550_s18 = smov 0   ;;  %s2552_s19 = smov 0  }
   0x9   :  { %s2554_s20 = smov 0   ;;  %s2556_s21 = smov 0  }
   0xa   :  { %s2558_s22 = smov 0   ;;  %s2560_s23 = smov 0  }
   0xb LB: > { %2973 = sst [smem:[#allocation18_spill]] %s2435_s18  ;;  %s1854_s24 = sadd.s32 4294967295, %s2455_s23   ;;  %s2455_s23 = sphi %s2560_s23, %s31_s23   ;;  %s2451_s22 = sphi %s2558_s22, %s3000_s22   ;;  %s2447_s21 = sphi %s2556_s21, %s2999_s21   ;;  %s2443_s20 = sphi %s2554_s20, %s2998_s20   ;;  %s2439_s19 = sphi %s2552_s19, %s3002_s19   ;;  %s2435_s18 = sphi %s2550_s18, %s3001_s18  }
   0xc   : > { %2974 = sst [smem:[#allocation19_spill]] %s2443_s20  ;;  %s1855_s25 = sadd.s32 4294967294, %s2455_s23  }
   0xd   : > { %2975 = sst [smem:[#allocation20_spill]] %s2451_s22  ;;  %s43_s26 = sadd.s32 1, %s2451_s22 }
   0xe   : > { %2976 = sst [smem:[#allocation21_spill]] %s2455_s23  ;;  %s379_s27 = sadd.s32 1, %s2443_s20 }
   0xf   : > { %p45_p0 = scmp.ge.s32.totalorder %s43_s26, 2  ;;  %p389_p1 = scmp.ne.s32.totalorder %s2443_s20, %s2439_s19 }
  0x10   : > { %p390_p2 = scmp.eq.s32.totalorder %s1854_s24, 1  ;;  %p395_p3 = scmp.ne.s32.totalorder %s2439_s19, %s2435_s18 }
  0x11   : > { %s3004_s26 = smov (%p45_p0, %s43_s26), 0  ;;  %p396_p5 = scmp.eq.s32.totalorder %s1855_s25, 1 }
  0x12   : > { %2977 = sst [smem:[#allocation22_spill]] %s3004_s26  ;;  %p2590_p4 = por %p390_p2, %p389_p1 }
  0x13   : > { %s374_s29 = ssub.s32 %s2451_s22, %s3004_s26  ;;  %p1856_p6 = scmp.ge.s32.totalorder %s2455_s23, 1 }
  0x14   : > { %s2978_s28 = scalar_select %p2590_p4, 1, 0 }
  0x15   : > { %p377_p7 = scmp.eq.s32.totalorder %s374_s29, 0  ;;  %p2597_p8 = por %p396_p5, %p395_p3 }
  0x16   : > { %p403_p9 = scmp.lt.s32.totalorder %s2455_s23, 3  ;;  %p2609_p11 = scmp.eq.s32.totalorder %s1854_s24, 0 }
  0x17   : > { %s2979_s30 = scalar_select %p2597_p8, 1, 0 }
  0x18   : > { %s2603_s16 = scalar_select %p377_p7, %s2443_s20, %s379_s27  }
  0x19   : > { %2980 = sst [smem:[#allocation23_spill]] %s2979_s30  ;;  %p2605_p10 = pnand %p1856_p6, %p403_p9 }
  0x1a   : > { %2981 = sst [smem:[#allocation24_spill]] %s2603_s16  ;;  %s2457_s25 = smov [#allocation7]  }
  0x1b   : > { %s2982_s17 = scalar_select %p2605_p10, 1, 0 }
  0x1c   : > { %s2983_s18 = scalar_select %p2609_p11, 1, 0 }
  0x1d   : > { %p2108_p12 = pneg %p2605_p10  ;;  %s427_s29 = sshll.u32 %s2457_s25, 4  ;;  %s428_s29 = int_to_ptr.vmem [resolvable:$true] %s427_s29 }
  0x1e   : > { %s2458_s26 = smov [#allocation10]   ;;  %s2248_s16 = scalar_lea.vmem %s428_s29, 16 }
  0x1f   : > { %s460_s22 = sshll.u32 %s2458_s26, 4  ;;  %p2617_p13 = pnand %p2609_p11, %p2108_p12  ;;  %s461_s22 = int_to_ptr.vmem [resolvable:$true] %s460_s22 }
  0x20   : > { %p2249_p1 = scmp.ne.s32.totalorder %s428_s29, %s2248_s16  ;;  %s2255_s25 = scalar_lea.vmem %s428_s29, 32 }
  0x21   : > { %p2623_p0 = pneg %p2617_p13  ;;  %p2256_p5 = scmp.lt.s32.totalorder %s428_s29, %s428_s29 }
  0x22   : > { %p2257_p6 = scmp.lt.s32.totalorder %s2255_s25, %s2248_s16 }
  0x23   : > { %p2251_p2 = pnand %p2249_p1, %p2623_p0 }
  0x24   : > { %p2258_p7 = por %p2257_p6, %p2256_p5 }
  0x25   : > { %p2252_p3 = pneg %p2251_p2 }
  0x27   : > { %p2259_p9 = pnand %p2258_p7, %p2252_p3 }
  0x29   : > { %2262 = shalt.err (!%p2259_p9)
}
  0x2a   : > { %s2986_s3 = sld [smem:[#allocation26_spill]]  ;;  %s2274_s30 = scalar_lea.vmem %s461_s22, 16 }
  0x2b   : > { %p2275_p12 = scmp.ne.s32.totalorder %s461_s22, %s2274_s30  ;;  %s2281_s23 = scalar_lea.vmem %s461_s22, 32 }
  0x2c   : > { %p2282_p1 = scmp.lt.s32.totalorder %s461_s22, %s461_s22  ;;  %p2283_p2 = scmp.lt.s32.totalorder %s2281_s23, %s2274_s30 }
  0x2d   : > { %p2277_p8 = pnand %p2275_p12, %p2623_p0 }
  0x2e   : > { %p2284_p11 = por %p2283_p2, %p2282_p1 }
  0x2f   : > { %p2278_p4 = pneg %p2277_p8 }
  0x30   : > { %2114 = dma.hbm_to_vmem [thread:$0]  (!%p2617_p13), %s2986_s3, 16, %s428_s29, [#allocation8]  }
  0x31   : > { %p2285_p10 = pnand %p2284_p11, %p2278_p4 }
  0x33   : > { %2288 = shalt.err (!%p2285_p10)
}
  0x34   : > { %2120 = dma.hbm_to_vmem [thread:$0]  (!%p2617_p13), %s2950_s8, 16, %s461_s22, [#allocation11]  }
  0x35   : > { %s2459_s20 = smov [#allocation4]   ;;  %s2460_s26 = smov [#allocation9]  }
  0x36   : > { %s416_s29 = sshll.u32 %s2459_s20, 4  ;;  %s446_s3 = sshll.u32 %s2460_s26, 4  ;;  %s417_s29 = int_to_ptr.vmem [resolvable:$true] %s416_s29  ;;  %s447_s3 = int_to_ptr.vmem [resolvable:$true] %s446_s3 }
  0x37   : > { %s2300_s15 = scalar_lea.vmem %s417_s29, 16  ;;  %s2307_s23 = scalar_lea.vmem %s417_s29, 32 }
  0x38   : > { %p2301_p8 = scmp.ne.s32.totalorder %s417_s29, %s2300_s15  ;;  %p2308_p4 = scmp.lt.s32.totalorder %s417_s29, %s417_s29 }
  0x39   : > { %p2309_p10 = scmp.lt.s32.totalorder %s2307_s23, %s2300_s15 }
  0x3a   : > { %p2303_p3 = pnand %p2301_p8, %p2623_p0 }
  0x3b   : > { %p2310_p11 = por %p2309_p10, %p2308_p4 }
  0x3c   : > { %p2304_p5 = pneg %p2303_p3 }
  0x3e   : > { %p2311_p6 = pnand %p2310_p11, %p2304_p5 }
  0x40   : > { %2314 = shalt.err (!%p2311_p6)
}
  0x41   : > { %s2987_s2 = sld [smem:[#allocation25_spill]]  ;;  %s2326_s16 = scalar_lea.vmem %s447_s3, 256 }
  0x42   : > { %p2327_p7 = scmp.ne.s32.totalorder %s447_s3, %s2326_s16  ;;  %p2334_p1 = scmp.lt.s32.totalorder %s447_s3, %s447_s3 }
  0x43   : > { %p2335_p2 = scmp.lt.s32.totalorder %s2326_s16, %s2326_s16 }
  0x44   : > { %p2329_p9 = pnand %p2327_p7, %p2623_p0 }
  0x45   : > { %p2336_p8 = por %p2335_p2, %p2334_p1 }
  0x46   : > { %p2330_p12 = pneg %p2329_p9 }
  0x47   : > { %2111 = dma.hbm_to_vmem [thread:$0]  (!%p2617_p13), %s2987_s2, 16, %s417_s29, [#allocation5]  }
  0x48   : > { %p2337_p3 = pnand %p2336_p8, %p2330_p12 }
  0x4a   : > { %2340 = shalt.err (!%p2337_p3)
}
  0x4b   : > { %s2461_s15 = smov 64   ;;  %s2462_s25 = smov 4  }
  0x4c   : > { %2117 = dma.hbm_to_vmem [thread:$0]  (!%p2617_p13), %s2949_s7, 256, %s447_s3, [#allocation8], %s2461_s15, %s2461_s15, %s2462_s25  }
  0x4d   : > { %s2463_s29 = smov [#allocation12]  }
  0x4e   : > { %s471_s23 = sshll.u32 %s2463_s29, 4  ;;  %s472_s23 = int_to_ptr.vmem [resolvable:$true] %s471_s23 }
  0x4f   : > { %s2352_s30 = scalar_lea.vmem %s472_s23, 16  ;;  %s2359_s22 = scalar_lea.vmem %s472_s23, 32 }
  0x50   : > { %p2353_p5 = scmp.ne.s32.totalorder %s472_s23, %s2352_s30  ;;  %p2360_p11 = scmp.lt.s32.totalorder %s472_s23, %s472_s23 }
  0x51   : > { %p2361_p6 = scmp.lt.s32.totalorder %s2359_s22, %s2352_s30 }
  0x52   : > { %p2355_p4 = pnand %p2353_p5, %p2623_p0 }
  0x53   : > { %p2362_p7 = por %p2361_p6, %p2360_p11 }
  0x54   : > { %p2356_p10 = pneg %p2355_p4 }
  0x56   : > { %p2363_p9 = pnand %p2362_p7, %p2356_p10 }
  0x58   : > { %2366 = shalt.err (!%p2363_p9)
}
  0x59   : > { %2123 = dma.hbm_to_vmem [thread:$0]  (!%p2617_p13), %s2951_s9, 16, %s472_s23, [#allocation11]  }
  0x5a   : > { %p2988_p12 = scmp.ne.s32.totalorder %s2982_s17, 0 }
  0x5b   : > { %p2989_p1 = scmp.ne.s32.totalorder (!%p2988_p12), %s2983_s18, 0 }
  0x5c   : > { %516 = sbr.rel (%p2988_p12) target bundleno = 3593 (0xe09), region = 80 }
  0x61   : > { %2418 = dma.done.wait (%p2989_p1), [#allocation5], 16  }
  0x62   : > { %2420 = vsyncadd (%p2989_p1), [#allocation5], 4294967280 }
  0x63   : > { %2422 = dma.done.wait (%p2989_p1), [#allocation8], 272  }
  0x64   : > { %2424 = vsyncadd (%p2989_p1), [#allocation8], 4294967024 }
  0x65   : > { %2426 = dma.done.wait (%p2989_p1), [#allocation11], 32  }
  0x66   : > { %2428 = vsyncadd (%p2989_p1), [#allocation11], 4294967264  ;;  %p586_p13 = scmp.lt.s32.totalorder %s2447_s21, 1  ;;  %vm605_vm0 = vcmask 261120   ;;  %v2199_v14 = vld [vmem:[%s2947_s5 + $0x8] sm:$0xff]   ;;  %v2464_v15 = vmov 0.0  }
  0x67   : > { %1962 = vmatprep.subr.bf16.mxu1 %v2464_v15  ;;  %1992 = vmatprep.subr.bf16.mxu0 %v2464_v15  ;;  %v2200_v16 = vld [vmem:[%s2947_s5] sm:$0xff]   ;;  %vm2465_vm1 = vmmov 0   ;;  %v1872_v24 = vld [vmem:[#allocation4] ss:$0 sm:$0xff]  ;;  %v1873_v26 = vld [vmem:[#allocation7] ss:$0 sm:$0xff] }
  0x68   : > { %s587_s2 = scalar_select %p586_p13, %s2447_s21, 1  ;;  %1963 = vmatpush3.bf16.msra.mxu1 %v2199_v14  ;;  %1966 = vmatprep.mubr.msk.bf16.mxu1 %vm2465_vm1, %v2464_v15  ;;  %v2201_v29 = vld [vmem:[%s2948_s6 + $0x8] sm:$0xff]   ;;  %v2202_v32 = vld [vmem:[%s2948_s6] sm:$0xff]   ;;  %vm850_vm2 = vcmask 64512   ;;  %vm912_vm3 = vcmask 1043456  }
  0x69   : > { %1964 = vmatprep.subr.bf16.mxu1 %v2464_v15  ;;  %1994 = vmatprep.mubr.msk.bf16.mxu0 %vm2465_vm1, %v2464_v15  ;;  %v2203_v34 = vld [vmem:[%s2946_s4 + $0x8] sm:$0xff]   ;;  %v2204_v36 = vld [vmem:[%s2946_s4] sm:$0xff]   ;;  %s2466_s15 = smov 120   ;;  %s2467_s25 = smov 112  }
  0x6a   : > { %s1870_s3 = sshll.u32 %s587_s2, 3  ;;  %s583_s17 = sand.u32 1, %s2439_s19  }
  0x6b   : > { %s596_s24 = scalar_lea.vmem %s2943_s1, %s1870_s3  ;;  %s592_s20 = scalar_lea.vmem %s2942_s0, %s1870_s3 }
  0x6c   : > { %v602_v0 = vld [vmem:[%s596_s24] sm:$0xff]  ;;  %1965 = vmatpush3.bf16.msra.mxu1 %v2200_v16  ;;  %s1869_s27 = sshll.u32 %s583_s17, 3  ;;  %s2990_s23 = sld [smem:[#allocation27_spill]] }
  0x6d   : > { %v2684_v1 = vld [vmem:[%s592_s20] sm:$0xff]  ;;  %v606_v2 = vsel %vm605_vm0, %v602_v0, 0.0  ;;  %1970 = vmatprep.subr.bf16.mxu1 %v2464_v15  ;;  %s2468_s20 = smov 104   ;;  %p2992_p2 = scmp.ne.s32.totalorder %s2978_s28, 0 }
  0x6e   : > { %v756_v3 = vsel %vm605_vm0, %v2684_v1, 0.0  ;;  %607 = vadd.xlane.f32.xlu0 %v606_v2  ;;  %s2469_s2 = smov [#allocation13]  }
  0x6f   : > { %s2371_s3 = sshll.u32 %s2469_s2, 4  ;;  %s2372_s3 = int_to_ptr.vmem [resolvable:$false] %s2371_s3 }
  0x72   : > { %757 = vadd.xlane.f32.xlu0 %v756_v3  ;;  %s2991_s30 = smov %s2990_s23 }
  0xf7   : > { %v608_v4 = vpop.xlane.xlu0 %607 }
  0xf8   : > { %v610_v5 = vmul.f32 0.03125, %v608_v4 }
  0xfa   : > { %v611_v6 = vsub.f32 %v602_v0, %v610_v5 }
  0xfb   : > { %v758_v7 = vpop.xlane.xlu0 %757 }
  0xfc   : > { %v760_v8 = vmul.f32 0.03125, %v758_v7  ;;  %v612_v9 = vmul.f32 %v611_v6, %v611_v6 }
  0xfe   : > { %v761_v10 = vsub.f32 %v2684_v1, %v760_v8  ;;  %v613_v11 = vsel %vm605_vm0, %v612_v9, 0.0 }
  0xff   : > { %614 = vadd.xlane.f32.xlu1 %v613_v11 }
 0x100   : > { %v762_v12 = vmul.f32 %v761_v10, %v761_v10 }
 0x102   : > { %v763_v13 = vsel %vm605_vm0, %v762_v12, 0.0 }
 0x103   : > { %764 = vadd.xlane.f32.xlu1 %v763_v13 }
 0x188   : > { %v615_v17 = vpop.xlane.xlu1 %614 }
 0x189   : > { %v616_v18 = vmul.f32 0.03125, %v615_v17 }
 0x18b   : > { %v617_v19 = vadd.f32 1e-05, %v616_v18 }
 0x18c   : > { %v765_v20 = vpop.xlane.xlu1 %764 }
 0x18d   : > { %2215 = vrsqrt.f32 %v617_v19  ;;  %v766_v21 = vmul.f32 0.03125, %v765_v20 }
 0x18f   : > { %v767_v22 = vadd.f32 1e-05, %v766_v21 }
 0x191   : > { %2217 = vrsqrt.f32 %v767_v22 }
 0x19a   : > { %v2216_v23 = vpop.eup %2215 }
 0x19b   : > { %v619_v25 = vmul.f32 %v2216_v23, %v611_v6 }
 0x19d   : > { %v626_v27 = vmul.f32 %v1872_v24, %v619_v25 }
 0x19e   : > { %v2218_v31 = vpop.eup %2217 }
 0x19f   : > { %v633_v28 = vadd.f32 %v1873_v26, %v626_v27  ;;  %v769_v33 = vmul.f32 %v2218_v31, %v761_v10 }
 0x1a1   : > { %v634_v30 = vpack.c.bf16 %v633_v28, %v633_v28  ;;  %v776_v35 = vmul.f32 %v1872_v24, %v769_v33 }
 0x1a3   : > { %1967 = vmatmul.mubr.msk.bf16.vlgmr.msra.gmra.mxu1 %vm605_vm0, %v634_v30  ;;  %v783_v37 = vadd.f32 %v1873_v26, %v776_v35  ;;  %v1073_v26 = vld [vmem:[#allocation9 + $0x4] sm:$0xf] }
 0x1a4   : > { %1971 = vmatpush3.bf16.msra.mxu1 %v2201_v29  ;;  %1974 = vmatprep.mubr.msk.bf16.mxu1 %vm2465_vm1, %v2464_v15  ;;  %v1078_v27 = vsel %vm912_vm3, %v1073_v26, 0 }
 0x1a5   : > { %1972 = vmatprep.subr.bf16.mxu1 %v2464_v15  ;;  %v784_v38 = vpack.c.bf16 %v783_v37, %v783_v37 }
 0x1a8   : > { %1973 = vmatpush3.bf16.msra.mxu1 %v2202_v32 }
 0x1a9   : > { %1978 = vmatprep.subr.bf16.mxu1 %v2464_v15 }
 0x1ab   : > { %1975 = vmatmul.mubr.msk.bf16.vlgmr.msra.gmra.mxu1 %vm605_vm0, %v634_v30  ;;  %v957_v30 = vld [vmem:[#allocation9] sm:$0xf] }
 0x1ac   : > { %1979 = vmatpush3.bf16.msra.mxu1 %v2203_v34  ;;  %1982 = vmatprep.mubr.msk.bf16.mxu1 %vm2465_vm1, %v2464_v15  ;;  %v1124_v33 = vsel %vm912_vm3, %v957_v30, 0 }
 0x1ad   : > { %1980 = vmatprep.subr.bf16.mxu1 %v2464_v15 }
 0x1b0   : > { %1981 = vmatpush3.bf16.msra.mxu1 %v2204_v36 }
 0x1b1   : > { %1986 = vmatprep.subr.bf16.mxu1 %v2464_v15 }
 0x1b3   : > { %1983 = vmatmul.mubr.msk.bf16.vlgmr.msra.gmra.mxu1 %vm605_vm0, %v784_v38 }
 0x1b4   : > { %1988 = vmatprep.mubr.msk.bf16.mxu1 %vm2465_vm1, %v2464_v15 }
 0x263   : > { %v688_v39 = vpop.f32.mrf.mxu1 }
 0x264   : > { %694 = vst.msk [vmem:[#allocation2] sm:$0xff] %vm605_vm0, %v688_v39 }
 0x265   : > { %v1968_v40 = vpop.f32.mrf.mxu1 }
 0x267   : > { %v691_v41 = vpop.f32.mrf.mxu1 }
 0x269   : > { %v1969_v42 = vpop.f32.mrf.mxu1 }
 0x26b   : > { %v745_v43 = vpop.f32.mrf.mxu1  ;;  %v845_v44 = vld [vmem:[#allocation2] sm:$0xff] }
 0x26c   : > { %751 = vst.msk [vmem:[#allocation3] sm:$0xff] %vm605_vm0, %v745_v43  ;;  %v2733_v45 = vpack.c.bf16 %v845_v44, %v845_v44 }
 0x26d   : > { %v1976_v46 = vpop.f32.mrf.mxu1 }
 0x26e   : > { %962 = vrot.lane.b32.xlu0 %v2733_v45, %s2466_s15  ;;  %v855_v47 = vsel %vm850_vm2, %v2733_v45, 0 }
 0x26f   : > { %v748_v48 = vpop.f32.mrf.mxu1  ;;  %1987 = vmatpush3.bf16.xpose.msra.mxu1 %v855_v47 }
 0x270   : > { %1998 = vmatprep.subr.bf16.mxu1 %v2464_v15 }
 0x271   : > { %v1977_v49 = vpop.f32.mrf.mxu1 }
 0x273   : > { %v838_v50 = vpop.f32.mrf.mxu1  ;;  %v846_v51 = vld [vmem:[#allocation3] sm:$0xff] }
 0x274   : > { %v844_v52 = vmul.f32 0.35355338, %v838_v50  ;;  %v2740_v53 = vpack.c.bf16 %v846_v51, %v846_v51 }
 0x275   : > { %v1984_v54 = vpop.f32.mrf.mxu1 }
 0x276   : > { %v2742_v55 = vpack.c.bf16 %v844_v52, %v844_v52  ;;  %v914_v56 = vsel %vm912_vm3, %v2740_v53, 0 }
 0x277   : > { %v841_v57 = vpop.f32.mrf.mxu1  ;;  %1993 = vmatpush3.bf16.msra.mxu0 %v914_v56 }
 0x278   : > { %959 = vrot.lane.b32.xlu1 %v2742_v55, %s2466_s15  ;;  %1989 = vmatmul.mubr.msk.bf16.vlgmr.msra.gmra.mxu1 %vm850_vm2, %v2742_v55 }
 0x279   : > { %v1985_v58 = vpop.f32.mrf.mxu1  ;;  %2000 = vmatprep.mubr.msk.bf16.mxu1 %vm2465_vm1, %v2464_v15  ;;  %2004 = vmatprep.subr.bf16.mxu0 %v2464_v15 }
 0x2e0   : > { %v963_v59 = vpop.permute.xlu0 %962 }
 0x2e1   : > { %v968_v60 = vsel %vm850_vm2, %v963_v59, 0 }
 0x2e2   : > { %1999 = vmatpush3.bf16.xpose.msra.mxu1 %v968_v60 }
 0x2e3   : > { %2010 = vmatprep.subr.bf16.mxu1 %v2464_v15 }
 0x2ea   : > { %v960_v61 = vpop.permute.xlu1 %959 }
 0x2eb   : > { %2001 = vmatmul.mubr.msk.bf16.vlgmr.msra.gmra.mxu1 %vm850_vm2, %v960_v61 }
 0x2ec   : > { %2012 = vmatprep.mubr.msk.bf16.mxu1 %vm2465_vm1, %v2464_v15  ;;  %2011 = vmatpush3.bf16.msra.mxu1 %v1078_v27 }
 0x2ed   : > { %2022 = vmatprep.subr.bf16.mxu1 %v2464_v15 }
 0x338   : > { %v891_v62 = vpop.f32.mrf.mxu1 }
 0x339   : > { %v897_v63 = vsel %vm850_vm2, %v891_v62, -inf }
 0x33a   : > { %898 = vmax.xlane.f32.xlu1 %v897_v63  ;;  %v1990_v0 = vpop.f32.mrf.mxu1 }
 0x33c   : > { %v894_v2 = vpop.f32.mrf.mxu1 }
 0x33e   : > { %v1991_v3 = vpop.f32.mrf.mxu1 }
 0x3ab   : > { %v1004_v4 = vpop.f32.mrf.mxu1 }
 0x3ac   : > { %v1010_v5 = vsel %vm850_vm2, %v1004_v4, -inf }
 0x3ad   : > { %1011 = vmax.xlane.f32.xlu0 %v1010_v5  ;;  %v2002_v6 = vpop.f32.mrf.mxu1 }
 0x3af   : > { %v1007_v7 = vpop.f32.mrf.mxu1 }
 0x3b1   : > { %v2003_v8 = vpop.f32.mrf.mxu1 }
 0x3c3   : > { %v899_v9 = vpop.xlane.xlu1 %898 }
 0x3c4   : > { %v900_v10 = vsub.f32 %v891_v62, %v899_v9 }
 0x3c6   : > { %v901_v11 = vmul.f32 1.442695, %v900_v10 }
 0x3c8   : > { %2219 = vpow2.f32 %v901_v11 }
 0x3d5   : > { %v2220_v12 = vpop.eup %2219 }
 0x3d6   : > { %v903_v13 = vsel %vm850_vm2, %v2220_v12, 0.0 }
 0x3d7   : > { %904 = vadd.xlane.f32.xlu0 %v903_v13 }
 0x3ed   : > { %1023 = vrot.lane.b32.xlu0 %v2740_v53, %s2466_s15 }
 0x436   : > { %v1012_v14 = vpop.xlane.xlu0 %1011 }
 0x437   : > { %v1013_v16 = vsub.f32 %v1004_v4, %v1012_v14 }
 0x439   : > { %v1014_v17 = vmul.f32 1.442695, %v1013_v16 }
 0x43b   : > { %2221 = vpow2.f32 %v1014_v17 }
 0x448   : > { %v2222_v18 = vpop.eup %2221 }
 0x449   : > { %v1016_v19 = vsel %vm850_vm2, %v2222_v18, 0.0 }
 0x44a   : > { %1017 = vadd.xlane.f32.xlu1 %v1016_v19 }
 0x45b   : > { %1168 = vrot.lane.b32.xlu1 %v2733_v45, %s2467_s25 }
 0x45f   : > { %1166 = vrot.lane.b32.xlu1 %v2742_v55, %s2467_s25 }
 0x460   : > { %v905_v20 = vpop.xlane.xlu0 %904 }
 0x461   : > { %2223 = vrcp.f32 %v905_v20 }
 0x464   : > { %v1024_v23 = vpop.permute.xlu0 %1023 }
 0x465   : > { %v1029_v25 = vsel %vm912_vm3, %v1024_v23, 0 }
 0x46e   : > { %v2224_v21 = vpop.eup %2223 }
 0x46f   : > { %v907_v22 = vmul.f32 %v2224_v21, %v2220_v12  ;;  %v1278_v12 = vld [vmem:[#allocation9 + $0x8] sm:$0xf] }
 0x470   : > { %v1283_v13 = vsel %vm912_vm3, %v1278_v12, 0 }
 0x471   : > { %v908_v24 = vpack.c.bf16 %v907_v22, %v907_v22 }
 0x473   : > { %1995 = vmatmul.mubr.msk.bf16.vlgmr.msra.gmra.mxu0 %vm850_vm2, %v908_v24 }
 0x474   : > { %2005 = vmatpush3.bf16.msra.mxu0 %v1029_v25  ;;  %2006 = vmatprep.mubr.msk.bf16.mxu0 %vm2465_vm1, %v2464_v15 }
 0x475   : > { %2016 = vmatprep.subr.bf16.mxu0 %v2464_v15 }
 0x4d3   : > { %v1018_v28 = vpop.xlane.xlu1 %1017 }
 0x4d4   : > { %2225 = vrcp.f32 %v1018_v28 }
 0x4d7   : > { %v1169_v39 = vpop.permute.xlu1 %1168 }
 0x4d8   : > { %v1174_v43 = vsel %vm850_vm2, %v1169_v39, 0 }
 0x4db   : > { %v1167_v47 = vpop.permute.xlu1 %1166 }
 0x4e1   : > { %v2226_v29 = vpop.eup %2225 }
 0x4e2   : > { %v1020_v31 = vmul.f32 %v2226_v29, %v2222_v18 }
 0x4e4   : > { %v1021_v32 = vpack.c.bf16 %v1020_v31, %v1020_v31 }
 0x4e6   : > { %2007 = vmatmul.mubr.msk.bf16.vlgmr.msra.gmra.mxu0 %vm850_vm2, %v1021_v32 }
 0x4e7   : > { %2017 = vmatpush3.bf16.msra.mxu0 %v1124_v33  ;;  %2018 = vmatprep.mubr.msk.bf16.mxu0 %vm2465_vm1, %v2464_v15 }
 0x4e8   : > { %2028 = vmatprep.subr.bf16.mxu0 %v2464_v15 }
 0x533   : > { %v950_v34 = vpop.f32.mrf.mxu0 }
 0x534   : > { %v956_v35 = vpack.c.bf16 %v950_v34, %v950_v34  ;;  %v1438_v34 = vld [vmem:[#allocation9 + $0xc] sm:$0xf] }
 0x535   : > { %v1996_v36 = vpop.f32.mrf.mxu0 }
 0x536   : > { %2019 = vmatmul.mubr.msk.bf16.vlgmr.msra.gmra.mxu0 %vm850_vm2, %v956_v35  ;;  %v1443_v35 = vsel %vm912_vm3, %v1438_v34, 0 }
 0x537   : > { %v953_v37 = vpop.f32.mrf.mxu0  ;;  %2030 = vmatprep.mubr.msk.bf16.mxu0 %vm2465_vm1, %v2464_v15 }
 0x539   : > { %v1997_v38 = vpop.f32.mrf.mxu0 }
 0x5a6   : > { %v1065_v40 = vpop.f32.mrf.mxu0 }
 0x5a7   : > { %v1071_v41 = vpack.c.bf16 %v1065_v40, %v1065_v40 }
 0x5a8   : > { %v2008_v42 = vpop.f32.mrf.mxu0 }
 0x5a9   : > { %2013 = vmatmul.mubr.msk.bf16.vlgmr.msra.gmra.mxu1 %vm850_vm2, %v1071_v41 }
 0x5aa   : > { %2023 = vmatpush3.bf16.xpose.msra.mxu1 %v1174_v43  ;;  %v1068_v44 = vpop.f32.mrf.mxu0  ;;  %2024 = vmatprep.mubr.msk.bf16.mxu1 %vm2465_vm1, %v2464_v15 }
 0x5ab   : > { %2034 = vmatprep.subr.bf16.mxu1 %v2464_v15 }
 0x5ac   : > { %v2009_v46 = vpop.f32.mrf.mxu0 }
 0x5b1   : > { %2025 = vmatmul.mubr.msk.bf16.vlgmr.msra.gmra.mxu1 %vm850_vm2, %v1167_v47 }
 0x5b2   : > { %2036 = vmatprep.mubr.msk.bf16.mxu1 %vm2465_vm1, %v2464_v15  ;;  %2035 = vmatpush3.bf16.msra.mxu1 %v1283_v13  ;;  %v1899_v13 = vld [vmem:[%s2952_s10] ss:$0 sm:$0xff] }
 0x5b3   : > { %2046 = vmatprep.subr.bf16.mxu1 %v2464_v15 }
 0x5f6   : > { %v2791_v48 = vpop.f32.mrf.mxu0 }
 0x5f8   : > { %v2020_v49 = vpop.f32.mrf.mxu0 }
 0x5fa   : > { %v1163_v50 = vpop.f32.mrf.mxu0 }
 0x5fc   : > { %v2021_v51 = vpop.f32.mrf.mxu0 }
 0x5fd   : > { %v1897_v51 = vld [vmem:[#allocation10] ss:$0 sm:$0xff] }
 0x669   : > { %v2793_v52 = vpop.f32.mrf.mxu1 }
 0x66a   : > { %v1161_v32 = vadd.f32 %v2791_v48, %v2793_v52 }
 0x66b   : > { %v2014_v54 = vpop.f32.mrf.mxu1 }
 0x66d   : > { %v1117_v56 = vpop.f32.mrf.mxu1 }
 0x66f   : > { %v2015_v57 = vpop.f32.mrf.mxu1 }
 0x671   : > { %v1210_v58 = vpop.f32.mrf.mxu1 }
 0x672   : > { %v1216_v59 = vsel %vm850_vm2, %v1210_v58, -inf }
 0x673   : > { %1217 = vmax.xlane.f32.xlu1 %v1216_v59  ;;  %v2026_v60 = vpop.f32.mrf.mxu1 }
 0x675   : > { %v1213_v61 = vpop.f32.mrf.mxu1 }
 0x677   : > { %v2027_v62 = vpop.f32.mrf.mxu1 }
 0x684   : > { %1328 = vrot.lane.b32.xlu1 %v2733_v45, %s2468_s20 }
 0x688   : > { %1326 = vrot.lane.b32.xlu1 %v2742_v55, %s2468_s20 }
 0x6fc   : > { %v1218_v63 = vpop.xlane.xlu1 %1217 }
 0x6fd   : > { %v1219_v0 = vsub.f32 %v1210_v58, %v1218_v63 }
 0x6ff   : > { %v1220_v2 = vmul.f32 1.442695, %v1219_v0 }
 0x700   : > { %v1329_v8 = vpop.permute.xlu1 %1328 }
 0x701   : > { %2227 = vpow2.f32 %v1220_v2  ;;  %v1334_v10 = vsel %vm850_vm2, %v1329_v8, 0  ;;  %v2206_v2 = vld [vmem:[%s2953_s11] sm:$0xff]  }
 0x704   : > { %v1327_v11 = vpop.permute.xlu1 %1326 }
 0x70e   : > { %v2228_v3 = vpop.eup %2227 }
 0x70f   : > { %v1222_v4 = vsel %vm850_vm2, %v2228_v3, 0.0 }
 0x710   : > { %1223 = vadd.xlane.f32.xlu0 %v1222_v4  ;;  %v2208_v4 = vld [vmem:[%s2955_s13 + $0x30] sm:$0xff]  }
 0x726   : > { %1228 = vrot.lane.b32.xlu0 %v2740_v53, %s2467_s25  ;;  %s1914_s25 = sshll.u32 %s2447_s21, 7  ;;  %s1707_s21 = scalar_lea.sflag [#allocation6], %s583_s17 }
 0x727   : > { %s2895_s22 = scalar_lea.hbm %s2990_s23, %s1914_s25 }
 0x799   : > { %v1224_v5 = vpop.xlane.xlu0 %1223 }
 0x79a   : > { %2229 = vrcp.f32 %v1224_v5  ;;  %v2209_v5 = vld [vmem:[%s2955_s13 + $0x28] sm:$0xff]  }
 0x79d   : > { %v1229_v6 = vpop.permute.xlu0 %1228 }
 0x79e   : > { %v1234_v7 = vsel %vm912_vm3, %v1229_v6, 0  ;;  %v2210_v6 = vld [vmem:[%s2955_s13 + $0x20] sm:$0xff]  }
 0x79f   : > { %2029 = vmatpush3.bf16.msra.mxu0 %v1234_v7  ;;  %v2211_v7 = vld [vmem:[%s2955_s13 + $0x18] sm:$0xff]  }
 0x7a0   : > { %2040 = vmatprep.subr.bf16.mxu0 %v2464_v15 }
 0x7a7   : > { %v2230_v45 = vpop.eup %2229 }
 0x7a8   : > { %v1226_v55 = vmul.f32 %v2230_v45, %v2228_v3  ;;  %v2207_v3 = vld [vmem:[%s2955_s13 + $0x38] sm:$0xff]   ;;  %v2212_v45 = vld [vmem:[%s2955_s13 + $0x10] sm:$0xff]  }
 0x7aa   : > { %v1227_v9 = vpack.c.bf16 %v1226_v55, %v1226_v55 }
 0x7ac   : > { %2031 = vmatmul.mubr.msk.bf16.vlgmr.msra.gmra.mxu0 %vm850_vm2, %v1227_v9 }
 0x7ad   : > { %2041 = vmatpush3.bf16.xpose.msra.mxu0 %v1334_v10  ;;  %2042 = vmatprep.mubr.msk.bf16.mxu0 %vm2465_vm1, %v2464_v15 }
 0x7ae   : > { %2052 = vmatprep.subr.bf16.mxu0 %v2464_v15 }
 0x7b4   : > { %2043 = vmatmul.mubr.msk.bf16.vlgmr.msra.gmra.mxu0 %vm850_vm2, %v1327_v11  ;;  %v1898_v11 = vld [vmem:[#allocation12] ss:$0 sm:$0xff] }
 0x7b5   : > { %2054 = vmatprep.mubr.msk.bf16.mxu0 %vm2465_vm1, %v2464_v15  ;;  %2053 = vmatpush3.bf16.msra.mxu0 %v1443_v35 }
 0x7b6   : > { %2066 = vmatprep.subr.bf16.mxu0 %v2464_v15 }
 0x86c   : > { %v1270_v14 = vpop.f32.mrf.mxu0 }
 0x86d   : > { %v1276_v16 = vpack.c.bf16 %v1270_v14, %v1270_v14 }
 0x86e   : > { %v2032_v17 = vpop.f32.mrf.mxu0 }
 0x86f   : > { %2037 = vmatmul.mubr.msk.bf16.vlgmr.msra.gmra.mxu1 %vm850_vm2, %v1276_v16 }
 0x870   : > { %v1273_v18 = vpop.f32.mrf.mxu0  ;;  %2048 = vmatprep.mubr.msk.bf16.mxu1 %vm2465_vm1, %v2464_v15 }
 0x871   : > { %v2213_v18 = vld [vmem:[%s2955_s13 + $0x8] sm:$0xff]  }
 0x872   : > { %v2033_v19 = vpop.f32.mrf.mxu0 }
 0x873   : > { %v2214_v19 = vld [vmem:[%s2955_s13] sm:$0xff]  }
 0x874   : > { %v1370_v20 = vpop.f32.mrf.mxu0 }
 0x875   : > { %v1376_v21 = vsel %vm850_vm2, %v1370_v20, -inf }
 0x876   : > { %1377 = vmax.xlane.f32.xlu0 %v1376_v21  ;;  %v2044_v22 = vpop.f32.mrf.mxu0 }
 0x878   : > { %v1373_v23 = vpop.f32.mrf.mxu0 }
 0x87a   : > { %v2045_v24 = vpop.f32.mrf.mxu0 }
 0x88c   : > { %1388 = vrot.lane.b32.xlu0 %v2740_v53, %s2468_s20  ;;  %s585_s20 = scalar_lea.vmem [#allocation13], %s1869_s27  ;;  %s2373_s27 = scalar_lea.vmem %s2372_s3, 256 }
 0x88d   : > { %s1721_s18 = sshll.u32 %s585_s20, 4  ;;  %s2897_s18 = int_to_ptr.vmem [resolvable:$true] %s1721_s18 }
 0x88e   : > { %s2367_s16 = scalar_lea.vmem %s2897_s18, 128  ;;  %p2374_p5 = scmp.lt.s32.totalorder %s2897_s18, %s2372_s3 }
 0x88f   : > { %p2368_p0 = scmp.ne.s32.totalorder %s2897_s18, %s2367_s16  ;;  %p2375_p4 = scmp.lt.s32.totalorder %s2373_s27, %s2367_s16 }
 0x891   : > { %p2369_p8 = pnand %p2368_p0, %p2992_p2  ;;  %p2376_p10 = por %p2375_p4, %p2374_p5 }
 0x893   : > { %p2370_p3 = pneg %p2369_p8 }
 0x895   : > { %p2377_p11 = pnand %p2376_p10, %p2370_p3 }
 0x8ff   : > { %v1378_v25 = vpop.xlane.xlu0 %1377 }
 0x900   : > { %v1379_v26 = vsub.f32 %v1370_v20, %v1378_v25  ;;  %v1900_v20 = vld [vmem:[%s2954_s12] ss:$0 sm:$0xff] }
 0x902   : > { %v1380_v27 = vmul.f32 1.442695, %v1379_v26 }
 0x903   : > { %v1389_v28 = vpop.permute.xlu0 %1388 }
 0x904   : > { %2231 = vpow2.f32 %v1380_v27  ;;  %v1394_v29 = vsel %vm912_vm3, %v1389_v28, 0 }
 0x905   : > { %2047 = vmatpush3.bf16.msra.mxu1 %v1394_v29 }
 0x906   : > { %2058 = vmatprep.subr.bf16.mxu1 %v2464_v15 }
 0x911   : > { %v2232_v30 = vpop.eup %2231 }
 0x912   : > { %v1382_v31 = vsel %vm850_vm2, %v2232_v30, 0.0 }
 0x913   : > { %1383 = vadd.xlane.f32.xlu1 %v1382_v31 }
 0x92f   : > { %v1319_v33 = vpop.f32.mrf.mxu1 }
 0x930   : > { %v1325_v53 = vadd.f32 %v1319_v33, %v1161_v32 }
 0x931   : > { %v2038_v36 = vpop.f32.mrf.mxu1 }
 0x933   : > { %v1322_v37 = vpop.f32.mrf.mxu1 }
 0x935   : > { %v2039_v38 = vpop.f32.mrf.mxu1 }
 0x99c   : > { %v1384_v39 = vpop.xlane.xlu1 %1383 }
 0x99d   : > { %2233 = vrcp.f32 %v1384_v39 }
 0x9aa   : > { %v2234_v40 = vpop.eup %2233 }
 0x9ab   : > { %v1386_v41 = vmul.f32 %v2234_v40, %v2232_v30 }
 0x9ad   : > { %v1387_v42 = vpack.c.bf16 %v1386_v41, %v1386_v41 }
 0x9af   : > { %2049 = vmatmul.mubr.msk.bf16.vlgmr.msra.gmra.mxu1 %vm850_vm2, %v1387_v42 }
 0x9b0   : > { %2062 = vmatprep.mubr.msk.bf16.mxu1 %vm2465_vm1, %v2464_v15 }
 0xa6f   : > { %v1430_v43 = vpop.f32.mrf.mxu1 }
 0xa70   : > { %v1436_v44 = vpack.c.bf16 %v1430_v43, %v1430_v43 }
 0xa71   : > { %v2050_v46 = vpop.f32.mrf.mxu1 }
 0xa72   : > { %2055 = vmatmul.mubr.msk.bf16.vlgmr.msra.gmra.mxu0 %vm850_vm2, %v1436_v44 }
 0xa73   : > { %v1433_v47 = vpop.f32.mrf.mxu1  ;;  %2082 = vmatprep.mubr.msk.bf16.mxu0 %vm2465_vm1, %v2464_v15  ;;  %2067 = vmatpush3.bf16.msra.mxu0 %v2207_v3 }
 0xa74   : > { %2068 = vmatprep.subr.bf16.mxu0 %v2464_v15 }
 0xa75   : > { %v2051_v48 = vpop.f32.mrf.mxu1 }
 0xa77   : > { %2069 = vmatpush3.bf16.msra.mxu0 %v2208_v4 }
 0xa78   : > { %2070 = vmatprep.subr.bf16.mxu0 %v2464_v15 }
 0xa7b   : > { %2071 = vmatpush3.bf16.msra.mxu0 %v2209_v5 }
 0xa7c   : > { %2072 = vmatprep.subr.bf16.mxu0 %v2464_v15 }
 0xa7f   : > { %2073 = vmatpush3.bf16.msra.mxu0 %v2210_v6 }
 0xa80   : > { %2074 = vmatprep.subr.bf16.mxu0 %v2464_v15 }
 0xa83   : > { %2075 = vmatpush3.bf16.msra.mxu0 %v2211_v7 }
 0xa84   : > { %2076 = vmatprep.subr.bf16.mxu0 %v2464_v15 }
 0xa87   : > { %2077 = vmatpush3.bf16.msra.mxu0 %v2212_v45 }
 0xa88   : > { %2078 = vmatprep.subr.bf16.mxu0 %v2464_v15 }
 0xa8b   : > { %2079 = vmatpush3.bf16.msra.mxu0 %v2213_v18 }
 0xa8c   : > { %2080 = vmatprep.subr.bf16.mxu0 %v2464_v15 }
 0xa8f   : > { %2081 = vmatpush3.bf16.msra.mxu0 %v2214_v19 }
 0xb32   : > { %v1479_v49 = vpop.f32.mrf.mxu0 }
 0xb33   : > { %v1485_v50 = vadd.f32 %v1479_v49, %v1325_v53 }
 0xb34   : > { %v2056_v52 = vpop.f32.mrf.mxu0 }
 0xb35   : > { %v1486_v54 = vadd.f32 %v1485_v50, %v2684_v1  ;;  %v2205_v1 = vld [vmem:[%s2953_s11 + $0x8] sm:$0xff]  }
 0xb36   : > { %v1482_v56 = vpop.f32.mrf.mxu0  ;;  %2059 = vmatpush3.bf16.msra.mxu1 %v2205_v1 }
 0xb37   : > { %v2835_v57 = vadd.f32 %v1897_v51, %v1486_v54  ;;  %2060 = vmatprep.subr.bf16.mxu1 %v2464_v15  ;;  %v1904_v15 = vld [vmem:[%s2956_s14] ss:$0 sm:$0xff] }
 0xb38   : > { %v2057_v58 = vpop.f32.mrf.mxu0 }
 0xb39   : > { %v1497_v59 = vsel %vm605_vm0, %v2835_v57, 0.0 }
 0xb3a   : > { %1498 = vadd.xlane.f32.xlu1 %v1497_v59  ;;  %2061 = vmatpush3.bf16.msra.mxu1 %v2206_v2 }
 0xbc3   : > { %v1499_v60 = vpop.xlane.xlu1 %1498 }
 0xbc4   : > { %v1500_v61 = vmul.f32 0.03125, %v1499_v60 }
 0xbc6   : > { %v1501_v62 = vsub.f32 %v2835_v57, %v1500_v61 }
 0xbc8   : > { %v1502_v63 = vmul.f32 %v1501_v62, %v1501_v62 }
 0xbca   : > { %v1503_v0 = vsel %vm605_vm0, %v1502_v63, 0.0 }
 0xbcb   : > { %1504 = vadd.xlane.f32.xlu1 %v1503_v0 }
 0xc54   : > { %v1505_v55 = vpop.xlane.xlu1 %1504 }
 0xc55   : > { %v1506_v8 = vmul.f32 0.03125, %v1505_v55 }
 0xc57   : > { %v1507_v9 = vadd.f32 1e-05, %v1506_v8 }
 0xc59   : > { %2235 = vrsqrt.f32 %v1507_v9 }
 0xc66   : > { %v2236_v10 = vpop.eup %2235 }
 0xc67   : > { %v1509_v12 = vmul.f32 %v2236_v10, %v1501_v62 }
 0xc69   : > { %v1516_v14 = vmul.f32 %v1898_v11, %v1509_v12 }
 0xc6b   : > { %v1523_v16 = vadd.f32 %v1899_v13, %v1516_v14 }
 0xc6d   : > { %v1524_v17 = vpack.c.bf16 %v1523_v16, %v1523_v16 }
 0xc6f   : > { %2063 = vmatmul.mubr.msk.bf16.vlgmr.msra.gmra.mxu1 %vm605_vm0, %v1524_v17 }
 0xd2f   : > { %v1585_v21 = vpop.f32.mrf.mxu1 }
 0xd30   : > { %v1586_v22 = vadd.f32 %v1900_v20, %v1585_v21 }
 0xd31   : > { %v2064_v23 = vpop.f32.mrf.mxu1 }
 0xd32   : > { %v1591_v24 = vmax.f32 %v1586_v22, 0.0 }
 0xd33   : > { %v1588_v25 = vpop.f32.mrf.mxu1 }
 0xd34   : > { %v1592_v26 = vpack.c.bf16 %v1591_v24, %v1591_v24 }
 0xd35   : > { %v2065_v27 = vpop.f32.mrf.mxu1 }
 0xd36   : > { %2083 = vmatmul.mubr.bf16.vlgmr.msra.gmra.mxu0 %v1592_v26 }
 0xdf6   : > { %v1698_v28 = vpop.f32.mrf.mxu0 }
 0xdf7   : > { %v1699_v29 = vadd.f32 %v1904_v15, %v1698_v28 }
 0xdf8   : > { %v2084_v30 = vpop.f32.mrf.mxu0 }
 0xdf9   : > { %v1704_v31 = vadd.f32 %v1699_v29, %v2835_v57 }
 0xdfa   : > { %v1701_v32 = vpop.f32.mrf.mxu0 }
 0xdfb   : > { %1705 = vst.msk [vmem:[%s585_s20] sm:$0xff] %vm605_vm0, %v1704_v31 }
 0xdfc   : > { %v2085_v33 = vpop.f32.mrf.mxu0 }
 0xdfd   : > { %2380 = shalt.err (!%p2377_p11)
}
 0xdfe   : > { %s2381_s24 = scalar_lea.hbm %s2895_s22, 128  ;;  %s2385_s25 = scalar_lea.hbm %s2991_s30, 256 }
 0xdff   : > { %p2382_p6 = scmp.ne.s32.totalorder %s2895_s22, %s2381_s24  ;;  %p2386_p12 = scmp.lt.s32.totalorder %s2895_s22, %s2991_s30 }
 0xe00   : > { %p2387_p1 = scmp.lt.s32.totalorder %s2385_s25, %s2381_s24 }
 0xe01   : > { %p2383_p7 = pnand %p2382_p6, %p2992_p2 }
 0xe02   : > { %p2388_p13 = por %p2387_p1, %p2386_p12 }
 0xe03   : > { %p2384_p9 = pneg %p2383_p7 }
 0xe05   : > { %p2389_p0 = pnand %p2388_p13, %p2384_p9 }
 0xe07   : > { %2392 = shalt.err (!%p2389_p0)
}
 0xe08   : > { %2106 = dma.vmem_to_hbm [thread:$0]  (%p2992_p2), %s2897_s18, 128, %s2895_s22, %s1707_s21  }
 0xe09 PF: > { %s2993_s29 = sld [smem:[#allocation21_spill]] }
 0xe0a   : > { %s2994_s23 = sld [smem:[#allocation18_spill]] }
 0xe0b   : > { %s2995_s16 = sld [smem:[#allocation23_spill]] }
 0xe0f   : > { %p2138_p8 = scmp.ge.s32.totalorder %s2993_s29, 2 }
 0xe10   : > { %s1733_s2 = sand.u32 1, %s2994_s23  }
 0xe11   : > { %p2996_p3 = scmp.ne.s32.totalorder %s2995_s16, 0  ;;  %s1734_s3 = scalar_lea.sflag [#allocation6], %s1733_s2 }
 0xe13   : > { %p2125_p5 = pnand %p2138_p8, %p2996_p3 }
 0xe15   : > { %p2126_p4 = pneg %p2125_p5 }
 0xe17   : > { %2430 = dma.done.wait (%p2126_p4), %s1734_s3, 128  }
 0xe18   : > { %2432 = vsyncadd (%p2126_p4), %s1734_s3, 4294967168  ;;  %s31_s23 = sadd.s32 1, %s2993_s29   ;;  %s2997_s28 = sld [smem:[#allocation19_spill]] }
 0xe19   : > { %p28_p10 = scmp.ge.s32.totalorder %s31_s23, 4   ;;  %s2998_s20 = sld [smem:[#allocation24_spill]] }
 0xe1a   : > { %s2999_s21 = sld [smem:[#allocation20_spill]]  ;;  %s3001_s18 = smov %s2439_s19 }
 0xe1b   : > { %s3000_s22 = sld [smem:[#allocation22_spill]]  ;;  %30 = sbr.rel (!%p28_p10) target bundleno = 11 (0xb), region = 146 }
 0xe1e   : > { %s3002_s19 = smov %s2997_s28 }
 0xe20   :  { %1739 = vsyncpa [#allocation5], 1 }
 0xe21   :  { %1741 = vsyncpa [#allocation5 + $0x1], 1 }
 0xe22   :  { %1742 = vsyncpa [#allocation8], 1 }
 0xe23   :  { %1743 = vsyncpa [#allocation11], 1 }
 0xe24   :  { %1744 = vsyncpa [#allocation6], 1 }
 0xe25   :  { %1746 = vsyncpa [#allocation6 + $0x1], 1 }

</bundles_post_ra>
